<compile_context>
chip_gen: v5e
topology: v5e:2x2
jax: 0.10.0
libtpu: 0.0.40
codegen_flags: <defaults>
</compile_context>

<pallas_src>
import jax
import jax.numpy as jnp
from jax.experimental import pallas as pl
from jax.experimental.pallas import tpu as pltpu


def _round_up(x, m):
    return ((x + m - 1) // m) * m


# -----------------------------------------------------------------------------
# Kernel: one (tm, N_pad) output tile with the FULL K reduction in a single
# MXU matmul. No scratch, no phases — just dot + f32 bias add.
# -----------------------------------------------------------------------------
def fused_fc_kernel(x_ref, w_ref, b_ref, o_ref):
    # x_ref: (tm, K_pad)  activations (bf16 or f32)
    # w_ref: (K_pad, N_pad) pre-transposed fused weight (resident across M tiles)
    # b_ref: (1, N_pad)   fused add_bais, float32 (resident)
    acc = jnp.dot(x_ref[...], w_ref[...], preferred_element_type=jnp.float32)
    o_ref[...] = (acc + b_ref[...]).astype(o_ref.dtype)


# -----------------------------------------------------------------------------
# Parameter packing — call ONCE at init time (not per forward call).
# -----------------------------------------------------------------------------
def pack_head_params(conv_weights, add_biases, *, dtype=jnp.bfloat16):
    """Fuse the 7 TfFcBlock heads into one padded, pre-transposed GEMM weight.

    conv_weights: list of (C_out_i, C_in, 1, 1) Conv2d weights (bias=False).
    add_biases:   list of (C_out_i,) `add_bais` parameters.
    Returns:
      w_packed: (K_pad, N_pad) weight in `dtype` (default bf16), K_pad/N_pad
                multiples of 128, transposed once here (init-time cost).
      b_packed: (1, N_pad) float32 fused bias (always f32 — added in f32).
      n_out:    total unpadded output width (257 for Recon3D).
    """
    c_in = conv_weights[0].shape[1]
    w = jnp.concatenate(
        [jnp.asarray(cw).reshape(cw.shape[0], c_in) for cw in conv_weights], axis=0)
    b = jnp.concatenate([jnp.asarray(ab).reshape(-1) for ab in add_biases], axis=0)
    n_out = w.shape[0]
    n_pad = _round_up(n_out, 128)
    k_pad = _round_up(c_in, 128)
    w = jnp.pad(w, ((0, n_pad - n_out), (0, k_pad - c_in)))
    w = jnp.transpose(w).astype(dtype)                 # (K_pad, N_pad), one-time
    b = jnp.pad(b, (0, n_pad - n_out)).reshape(1, n_pad).astype(jnp.float32)
    return w, b, n_out


# -----------------------------------------------------------------------------
# Fused FC call (collapsed-grid GEMM + bias)
# -----------------------------------------------------------------------------
def fused_fc(x2d, w_packed, b_packed, n_out, *, tm=None, interpret=False):
    """y[n, o] = sum_c x2d[n, c] * W_packed[c, o] + b[o] over all fused heads.

    x2d: (M, C_in) activations. Returns (M, n_out) float32.
    Tiling policy: full K and full N per tile; M is a single tile for typical
    Recon3D batches (grid == (1,)) and 256-wide tiles for large M (fits the
    scoped-VMEM default on v5e/v6e/v7x; ~6 MB bf16 / ~11 MB f32 at tm=256).
    """
    m, c_in = x2d.shape
    k_pad, n_pad = w_packed.shape
    assert k_pad >= c_in and b_packed.shape == (1, n_pad)

    # Sub-32-bit operands pack more sublanes per vreg: round M to 16 for bf16.
    itemsize = jnp.dtype(w_packed.dtype).itemsize
    sub = max(8, 32 // itemsize)

    if tm is None:
        m_pad = _round_up(m, sub)
        if m_pad <= 256:
            tm = m_pad                       # single M tile -> grid (1,)
        else:
            tm = 256                         # 256-wide tiles for large batches
            m_pad = _round_up(m_pad, tm)
    else:
        tm = _round_up(tm, sub)
        m_pad = _round_up(m, tm)

    x = x2d.astype(w_packed.dtype)
    if (m_pad, k_pad) != (m, c_in):
        x = jnp.pad(x, ((0, m_pad - m), (0, k_pad - c_in)))

    grid = (m_pad // tm,)
    # Weight/bias block indices are constant across the grid -> fetched once.
    cost = pl.CostEstimate(
        flops=2 * m_pad * k_pad * n_pad,
        transcendentals=0,
        bytes_accessed=(itemsize * m_pad * k_pad        # activations
                        + itemsize * k_pad * n_pad      # fused weight (once)
                        + 4 * n_pad                     # fused bias (f32)
                        + 4 * m_pad * n_pad))           # output (f32)

    out = pl.pallas_call(
        fused_fc_kernel,
        out_shape=jax.ShapeDtypeStruct((m_pad, n_pad), jnp.float32),
        grid_spec=pltpu.PrefetchScalarGridSpec(
            num_scalar_prefetch=0,
            grid=grid,
            in_specs=[
                pl.BlockSpec((tm, k_pad), lambda i: (i, 0)),     # activations
                pl.BlockSpec((k_pad, n_pad), lambda i: (0, 0)),  # weight (resident)
                pl.BlockSpec((1, n_pad), lambda i: (0, 0)),      # bias f32 (resident)
            ],
            out_specs=pl.BlockSpec((tm, n_pad), lambda i: (i, 0)),
        ),
        compiler_params=pltpu.CompilerParams(
            dimension_semantics=("parallel",)),
        cost_estimate=cost,
        interpret=interpret,
    )(x, w_packed, b_packed)
    return out[:m, :n_out]


def recon3d_head_forward(feat_nchw, w_packed, b_packed, n_out, **kw):
    """Recon3D tail: AdaptiveAvgPool2d((1,1)) + 7 TfFcBlock heads + concat.

    feat_nchw: (N, C_in, H, W) block4 output (NCHW).
    Returns (N, 257) = concat([id, ex, tex, angles, gamma, xy, z], dim=1).
    """
    # TODO(synk): global average pool is left as a tiny XLA reduce; fusing it
    # into the kernel would need an NCHW->lane-dense relayout of the feature
    # map that costs more than the ~1 us it saves at these shapes.
    pooled = jnp.mean(feat_nchw, axis=(2, 3))   # (N, C_in)
    return fused_fc(pooled, w_packed, b_packed, n_out, **kw)


def tf_fc_block(x_nchw, conv_weight, add_bias, **kw):
    """Single TfFcBlock.forward (kept for 1:1 module parity)."""
    n, c_in, h, w = x_nchw.shape
    assert h == 1 and w == 1
    w_p, b_p, n_out = pack_head_params([conv_weight], [add_bias])
    return fused_fc(x_nchw.reshape(n, c_in), w_p, b_p, n_out, **kw)


if __name__ == "__main__":
    key = jax.random.PRNGKey(0)

    N = 2
    C_IN = 2048                     # block4 output channels in Recon3D
    H = W = 2                       # small block4-like spatial map
    HEAD_DIMS = [80, 64, 80, 3, 27, 2, 1]   # id, ex, tex, angles, gamma, xy, z

    keys = jax.random.split(key, 1 + len(HEAD_DIMS))
    feat = jax.random.normal(keys[0], (N, C_IN, H, W), dtype=jnp.float32)
    conv_ws = [jax.random.normal(keys[1 + i], (d, C_IN, 1, 1), dtype=jnp.float32)
               * (1.0 / jnp.sqrt(jnp.float32(C_IN)))
               for i, d in enumerate(HEAD_DIMS)]
    add_bs = [jnp.ones((d,), dtype=jnp.float32) for d in HEAD_DIMS]  # torch.ones init

    # Reference (same math as PyTorch avgpool + 1x1 convs + add_bais + cat).
    pooled = feat.mean(axis=(2, 3))
    ref = jnp.concatenate(
        [pooled @ cw.reshape(d, C_IN).T + ab
         for cw, ab, d in zip(conv_ws, add_bs, HEAD_DIMS)], axis=1)

    # ---- default path: bf16 weights/activations, f32 accumulation + f32 bias --
    w_bf, b_bf, n_out = pack_head_params(conv_ws, add_bs)           # bf16 default
    out_bf = recon3d_head_forward(feat, w_bf, b_bf, n_out)
    jax.block_until_ready(out_bf)
    assert out_bf.shape == (N, sum(HEAD_DIMS))
    assert jnp.allclose(out_bf, ref, atol=1e-1, rtol=1e-1)

    # ---- float32 weight path ---------------------------------------------------
    w_f32, b_f32, _ = pack_head_params(conv_ws, add_bs, dtype=jnp.float32)
    out_f32 = recon3d_head_forward(feat, w_f32, b_f32, n_out)
    jax.block_until_ready(out_f32)
    assert jnp.allclose(out_f32, ref, atol=2e-2, rtol=2e-2)

    # ---- multi-M-tile path (grid > 1) -------------------------------------------
    big_m = 40
    xb = jax.random.normal(jax.random.PRNGKey(1), (big_m, C_IN), dtype=jnp.float32)
    out_big = fused_fc(xb, w_f32, b_f32, n_out, tm=16)               # grid == (3,)
    jax.block_until_ready(out_big)
    ref_big = jnp.concatenate(
        [xb @ cw.reshape(d, C_IN).T + ab
         for cw, ab, d in zip(conv_ws, add_bs, HEAD_DIMS)], axis=1)
    assert jnp.allclose(out_big, ref_big, atol=2e-2, rtol=2e-2)

    # ---- single TfFcBlock parity check ------------------------------------------
    y_id = tf_fc_block(pooled.reshape(N, C_IN, 1, 1), conv_ws[0], add_bs[0])
    jax.block_until_ready(y_id)
    assert jnp.allclose(y_id, ref[:, :HEAD_DIMS[0]], atol=1e-1, rtol=1e-1)

    print("KERNEL_OK")
</pallas_src>

<mosaic_0001>
module attributes {stable_mosaic.version = 11 : i64} {
  func.func @fused_fc_kernel(%arg0: i32, %arg1: memref<16x2048xbf16, #tpu.memory_space<vmem>>, %arg2: memref<2048x384xbf16, #tpu.memory_space<vmem>>, %arg3: memref<1x384xf32, #tpu.memory_space<vmem>>, %arg4: memref<16x384xf32, #tpu.memory_space<vmem>>) attributes {dimension_semantics = [#tpu.dimension_semantics<parallel>], iteration_bounds = array<i64: 1>, scalar_prefetch = 0 : i64, scratch_operands = 0 : i64, tpu.core_type = #tpu.core_type<tc>, window_params = [{transform_indices = @transform_0, window_bounds = array<i64: 16, 2048>}, {pipeline_mode = #tpu.pipeline_mode<synchronous>, transform_indices = @transform_1, window_bounds = array<i64: 2048, 384>}, {pipeline_mode = #tpu.pipeline_mode<synchronous>, transform_indices = @transform_2, window_bounds = array<i64: 1, 384>}, {transform_indices = @transform_3, window_bounds = array<i64: 16, 384>}]} {
    %c0 = arith.constant 0 : index
    %c0_0 = arith.constant 0 : index
    %0 = vector.load %arg1[%c0, %c0_0] : memref<16x2048xbf16, #tpu.memory_space<vmem>>, vector<16x2048xbf16>
    %c0_1 = arith.constant 0 : index
    %c0_2 = arith.constant 0 : index
    %1 = vector.load %arg2[%c0_1, %c0_2] : memref<2048x384xbf16, #tpu.memory_space<vmem>>, vector<2048x384xbf16>
    %cst = arith.constant dense<0.000000e+00> : vector<16x384xf32>
    %2 = tpu.matmul %0, %1, %cst {dimension_numbers = #tpu.dot_dimension_numbers<[1], [0], [0], [1], [0, 0, 1, 1], [], []>} : vector<16x2048xbf16>, vector<2048x384xbf16>, vector<16x384xf32> -> vector<16x384xf32>
    %c0_3 = arith.constant 0 : index
    %c0_4 = arith.constant 0 : index
    %3 = vector.load %arg3[%c0_3, %c0_4] : memref<1x384xf32, #tpu.memory_space<vmem>>, vector<1x384xf32>
    %4 = vector.broadcast %3 : vector<1x384xf32> to vector<16x384xf32>
    %5 = arith.addf %2, %4 : vector<16x384xf32>
    %c0_5 = arith.constant 0 : index
    %c0_6 = arith.constant 0 : index
    %6 = vector.load %arg4[%c0_5, %c0_6] : memref<16x384xf32, #tpu.memory_space<vmem>>, vector<16x384xf32>
    tpu.vector_store %arg4[%c0_5, %c0_6], %5 {strides = array<i32>} : memref<16x384xf32, #tpu.memory_space<vmem>>, vector<16x384xf32>,
    return
  }
  func.func @transform_0(%arg0: i32) -> (i32, i32) {
    %c0_i32 = arith.constant 0 : i32
    %c0_i32_0 = arith.constant 0 : i32
    return %arg0, %c0_i32 : i32, i32
  }
  func.func @transform_1(%arg0: i32) -> (i32, i32) {
    %c0_i32 = arith.constant 0 : i32
    %c0_i32_0 = arith.constant 0 : i32
    %c0_i32_1 = arith.constant 0 : i32
    return %c0_i32, %c0_i32_0 : i32, i32
  }
  func.func @transform_2(%arg0: i32) -> (i32, i32) {
    %c0_i32 = arith.constant 0 : i32
    %c0_i32_0 = arith.constant 0 : i32
    %c0_i32_1 = arith.constant 0 : i32
    return %c0_i32, %c0_i32_0 : i32, i32
  }
  func.func @transform_3(%arg0: i32) -> (i32, i32) {
    %c0_i32 = arith.constant 0 : i32
    %c0_i32_0 = arith.constant 0 : i32
    return %arg0, %c0_i32 : i32, i32
  }
}

</mosaic_0001>

<bundles_post_ra>
// kernel: tpu_custom_call.1
= control target key start
LH: loop header
LB: loop body
LE: loop exit
PB: predicated region body
PF: predicated region fallthrough
CT: control target
= control target key end

     0   :  { %8 = vsyncpa [#allocation3], 0  ;;  %s5747_s0 = inlined_call_operand.hbm [shape: bf16[16,2048], index: 0, kind: input, shape index: {}]   ;;  %s5748_s1 = inlined_call_operand.hbm [shape: bf16[2048,384], index: 1, kind: input, shape index: {}]   ;;  %s5749_s2 = inlined_call_operand.hbm [shape: f32[1,384], index: 2, kind: input, shape index: {}]   ;;  %s5750_s3 = inlined_call_operand.hbm [shape: f32[16,384], index: 3, kind: output, shape index: {}]  }
   0x1   :  { %9 = vsyncpa [#allocation6], 0  ;;  %s28_s14 = sshll.u32 %s5748_s1, 4  ;;  %s29_s14 = int_to_ptr.hbm [resolvable:$true] %s28_s14 }
   0x2   :  { %10 = vsyncpa [#allocation4], 0  ;;  %s5535_s15 = smov [#allocation5]   ;;  %s15_s19 = sshll.u32 %s5747_s0, 4  ;;  %s16_s19 = int_to_ptr.hbm [resolvable:$true] %s15_s19 }
   0x3   :  { %s30_s16 = sshll.u32 %s5535_s15, 4  ;;  %s5536_s20 = smov 192   ;;  %s31_s16 = int_to_ptr.vmem [resolvable:$true] %s30_s16 }
   0x4   :  { %s5537_s21 = smov 12   ;;  %s5538_s22 = smov [#allocation2]  }
   0x5   :  { %36 = dma.hbm_to_vmem [thread:$0]  %s29_s14, 49152, %s31_s16, [#allocation6], %s5536_s20, %s5536_s20, %s5537_s21  }
   0x6   :  { %s17_s23 = sshll.u32 %s5538_s22, 4  ;;  %s5539_s24 = smov 1024   ;;  %s18_s23 = int_to_ptr.vmem [resolvable:$true] %s17_s23 }
   0x7   :  { %s5540_s25 = smov 64   ;;  %s42_s27 = sshll.u32 %s5749_s2, 4  ;;  %s43_s27 = int_to_ptr.hbm [resolvable:$true] %s42_s27 }
   0x8   :  { %23 = dma.hbm_to_vmem [thread:$0]  %s16_s19, 2048, %s18_s23, [#allocation3], %s5539_s24, %s5539_s24, %s5540_s25  }
   0x9   :  { %s5541_s28 = smov [#allocation7]  }
   0xa   :  { %s44_s29 = sshll.u32 %s5541_s28, 4  ;;  %s45_s29 = int_to_ptr.vmem [resolvable:$true] %s44_s29 }
   0xb   :  { %47 = dma.hbm_to_vmem [thread:$0]  %s43_s27, 48, %s45_s29, [#allocation6]  }
   0xc   :  { %5529 = dma.done.wait [#allocation3], 2048  }
   0xd   :  { %5530 = vsyncadd [#allocation3], 4294965248 }
   0xe   :  { %5531 = dma.done.wait [#allocation6], 49200  }
   0xf   :  { %5532 = vsyncadd [#allocation6], 4294918096  ;;  %v3572_v0 = vld [vmem:[#allocation5 + $0xa8] sm:$0xf]  ;;  %v5060_v1 = vld [vmem:[#allocation5 + $0xb0] sm:$0xf0] }
  0x10   :  { %v3668_v2 = vld [vmem:[#allocation5 + $0x168] sm:$0xf]  ;;  %v3573_v3 = vor.u32 %v5060_v1, %v3572_v0  ;;  %v5084_v4 = vld [vmem:[#allocation5 + $0x170] sm:$0xf0]  ;;  %v3560_v11 = vld [vmem:[#allocation5 + $0x90] sm:$0xf] }
  0x11   :  { %v3764_v5 = vld [vmem:[#allocation5 + $0x228] sm:$0xf]  ;;  %v5108_v6 = vld [vmem:[#allocation5 + $0x230] sm:$0xf0]  ;;  %v3669_v7 = vor.u32 %v5084_v4, %v3668_v2  ;;  %v5057_v13 = vld [vmem:[#allocation5 + $0x98] sm:$0xf0] }
  0x12   :  { %v3765_v8 = vor.u32 %v5108_v6, %v3764_v5  ;;  %v3860_v9 = vld [vmem:[#allocation5 + $0x2e8] sm:$0xf]  ;;  %v5132_v10 = vld [vmem:[#allocation5 + $0x2f0] sm:$0xf0]  ;;  %2724 = vmatpush.bf16.msra.mxu0 %v3573_v3  ;;  %v3656_v14 = vld [vmem:[#allocation5 + $0x150] sm:$0xf]  ;;  %v3561_v16 = vor.u32 %v5057_v13, %v3560_v11 }
  0x13   :  { %v3861_v12 = vor.u32 %v5132_v10, %v3860_v9  ;;  %v5081_v15 = vld [vmem:[#allocation5 + $0x158] sm:$0xf0]  ;;  %2738 = vmatpush.bf16.msra.mxu1 %v3669_v7  ;;  %v3752_v18 = vld [vmem:[#allocation5 + $0x210] sm:$0xf]  ;;  %v3548_v23 = vld [vmem:[#allocation5 + $0x78] sm:$0xf] }
  0x14   :  { %2752 = vmatpush.bf16.msra.mxu2 %v3765_v8  ;;  %v3657_v17 = vor.u32 %v5081_v15, %v3656_v14  ;;  %v5105_v19 = vld [vmem:[#allocation5 + $0x218] sm:$0xf0]  ;;  %v3848_v20 = vld [vmem:[#allocation5 + $0x2d0] sm:$0xf]  ;;  %v5054_v24 = vld [vmem:[#allocation5 + $0x80] sm:$0xf0] }
  0x15   :  { %2766 = vmatpush.bf16.msra.mxu3 %v3861_v12  ;;  %v3753_v21 = vor.u32 %v5105_v19, %v3752_v18  ;;  %v5129_v22 = vld [vmem:[#allocation5 + $0x2d8] sm:$0xf0]  ;;  %v3644_v26 = vld [vmem:[#allocation5 + $0x138] sm:$0xf]  ;;  %v5078_v27 = vld [vmem:[#allocation5 + $0x140] sm:$0xf0]  ;;  %v3549_v29 = vor.u32 %v5054_v24, %v3548_v23 }
  0x16   :  { %v3849_v25 = vor.u32 %v5129_v22, %v3848_v20  ;;  %v3740_v28 = vld [vmem:[#allocation5 + $0x1f8] sm:$0xf]  ;;  %2725 = vmatpush.bf16.msra.mxu0 %v3561_v16  ;;  %v5102_v30 = vld [vmem:[#allocation5 + $0x200] sm:$0xf0]  ;;  %v3645_v33 = vor.u32 %v5078_v27, %v3644_v26  ;;  %v3536_v35 = vld [vmem:[#allocation5 + $0x60] sm:$0xf] }
  0x17   :  { %v3836_v31 = vld [vmem:[#allocation5 + $0x2b8] sm:$0xf]  ;;  %v5126_v32 = vld [vmem:[#allocation5 + $0x2c0] sm:$0xf0]  ;;  %2739 = vmatpush.bf16.msra.mxu1 %v3657_v17  ;;  %v3741_v34 = vor.u32 %v5102_v30, %v3740_v28  ;;  %v5051_v36 = vld [vmem:[#allocation5 + $0x68] sm:$0xf0] }
  0x18   :  { %2753 = vmatpush.bf16.msra.mxu2 %v3753_v21  ;;  %v3632_v37 = vld [vmem:[#allocation5 + $0x120] sm:$0xf]  ;;  %v3837_v38 = vor.u32 %v5126_v32, %v3836_v31  ;;  %v5075_v39 = vld [vmem:[#allocation5 + $0x128] sm:$0xf0]  ;;  %v3537_v44 = vor.u32 %v5051_v36, %v3536_v35  ;;  %v3524_v47 = vld [vmem:[#allocation5 + $0x48] sm:$0xf] }
  0x19   :  { %2767 = vmatpush.bf16.msra.mxu3 %v3849_v25  ;;  %v3728_v40 = vld [vmem:[#allocation5 + $0x1e0] sm:$0xf]  ;;  %v5099_v41 = vld [vmem:[#allocation5 + $0x1e8] sm:$0xf0]  ;;  %v3633_v45 = vor.u32 %v5075_v39, %v3632_v37  ;;  %v5048_v48 = vld [vmem:[#allocation5 + $0x50] sm:$0xf0] }
  0x1a   :  { %v3824_v42 = vld [vmem:[#allocation5 + $0x2a0] sm:$0xf]  ;;  %v5123_v43 = vld [vmem:[#allocation5 + $0x2a8] sm:$0xf0]  ;;  %2726 = vmatpush.bf16.msra.mxu0 %v3549_v29  ;;  %v3729_v46 = vor.u32 %v5099_v41, %v3728_v40  ;;  %v3620_v49 = vld [vmem:[#allocation5 + $0x108] sm:$0xf]  ;;  %v3525_v56 = vor.u32 %v5048_v48, %v3524_v47 }
  0x1b   :  { %2740 = vmatpush.bf16.msra.mxu1 %v3645_v33  ;;  %v3825_v50 = vor.u32 %v5123_v43, %v3824_v42  ;;  %v5072_v51 = vld [vmem:[#allocation5 + $0x110] sm:$0xf0]  ;;  %v3716_v52 = vld [vmem:[#allocation5 + $0x1c8] sm:$0xf]  ;;  %v3512_v59 = vld [vmem:[#allocation5 + $0x30] sm:$0xf] }
  0x1c   :  { %2754 = vmatpush.bf16.msra.mxu2 %v3741_v34  ;;  %v5096_v53 = vld [vmem:[#allocation5 + $0x1d0] sm:$0xf0]  ;;  %v3812_v54 = vld [vmem:[#allocation5 + $0x288] sm:$0xf]  ;;  %v3621_v57 = vor.u32 %v5072_v51, %v3620_v49  ;;  %v5045_v60 = vld [vmem:[#allocation5 + $0x38] sm:$0xf0] }
  0x1d   :  { %2768 = vmatpush.bf16.msra.mxu3 %v3837_v38  ;;  %v5120_v55 = vld [vmem:[#allocation5 + $0x290] sm:$0xf0]  ;;  %v3717_v58 = vor.u32 %v5096_v53, %v3716_v52  ;;  %v3608_v61 = vld [vmem:[#allocation5 + $0xf0] sm:$0xf]  ;;  %v5069_v63 = vld [vmem:[#allocation5 + $0xf8] sm:$0xf0]  ;;  %v3513_v4 = vor.u32 %v5045_v60, %v3512_v59 }
  0x1e   :  { %2727 = vmatpush.bf16.msra.mxu0 %v3537_v44  ;;  %v3813_v62 = vor.u32 %v5120_v55, %v3812_v54  ;;  %v3704_v0 = vld [vmem:[#allocation5 + $0x1b0] sm:$0xf]  ;;  %v5093_v1 = vld [vmem:[#allocation5 + $0x1b8] sm:$0xf0]  ;;  %v3609_v5 = vor.u32 %v5069_v63, %v3608_v61  ;;  %v3500_v7 = vld [vmem:[#allocation5 + $0x18] sm:$0xf] }
  0x1f   :  { %2741 = vmatpush.bf16.msra.mxu1 %v3633_v45  ;;  %v3800_v2 = vld [vmem:[#allocation5 + $0x270] sm:$0xf]  ;;  %v5117_v3 = vld [vmem:[#allocation5 + $0x278] sm:$0xf0]  ;;  %v3705_v6 = vor.u32 %v5093_v1, %v3704_v0  ;;  %v5042_v8 = vld [vmem:[#allocation5 + $0x20] sm:$0xf0] }
  0x20   :  { %2755 = vmatpush.bf16.msra.mxu2 %v3729_v46  ;;  %v3596_v9 = vld [vmem:[#allocation5 + $0xd8] sm:$0xf]  ;;  %v3801_v10 = vor.u32 %v5117_v3, %v3800_v2  ;;  %v5066_v11 = vld [vmem:[#allocation5 + $0xe0] sm:$0xf0]  ;;  %v3501_v16 = vor.u32 %v5042_v8, %v3500_v7  ;;  %v3488_v17 = vld [vmem:[#allocation5] sm:$0xf] }
  0x21   :  { %2769 = vmatpush.bf16.msra.mxu3 %v3825_v50  ;;  %v3692_v12 = vld [vmem:[#allocation5 + $0x198] sm:$0xf]  ;;  %v5090_v13 = vld [vmem:[#allocation5 + $0x1a0] sm:$0xf0]  ;;  %v5039_v18 = vld [vmem:[#allocation5 + $0x8] sm:$0xf0]  ;;  %v3597_v19 = vor.u32 %v5066_v11, %v3596_v9 }
  0x22   :  { %2728 = vmatpush.bf16.msra.mxu0 %v3525_v56  ;;  %v3788_v14 = vld [vmem:[#allocation5 + $0x258] sm:$0xf]  ;;  %v5114_v15 = vld [vmem:[#allocation5 + $0x260] sm:$0xf0]  ;;  %v3693_v20 = vor.u32 %v5090_v13, %v3692_v12  ;;  %v3584_v21 = vld [vmem:[#allocation5 + $0xc0] sm:$0xf]  ;;  %v3489_v31 = vor.u32 %v5039_v18, %v3488_v17 }
  0x23   :  { %2742 = vmatpush.bf16.msra.mxu1 %v3621_v57  ;;  %v5063_v22 = vld [vmem:[#allocation5 + $0xc8] sm:$0xf0]  ;;  %v3680_v23 = vld [vmem:[#allocation5 + $0x180] sm:$0xf]  ;;  %v3789_v24 = vor.u32 %v5114_v15, %v3788_v14  ;;  %v3956_v28 = vld [vmem:[#allocation5 + $0x3a8] sm:$0xf] }
  0x24   :  { %2756 = vmatpush.bf16.msra.mxu2 %v3717_v58  ;;  %v5087_v25 = vld [vmem:[#allocation5 + $0x188] sm:$0xf0]  ;;  %v3776_v26 = vld [vmem:[#allocation5 + $0x240] sm:$0xf]  ;;  %v5156_v29 = vld [vmem:[#allocation5 + $0x3b0] sm:$0xf0]  ;;  %v3585_v35 = vor.u32 %v5063_v22, %v3584_v21 }
  0x25   :  { %2770 = vmatpush.bf16.msra.mxu3 %v3813_v62  ;;  %v5111_v27 = vld [vmem:[#allocation5 + $0x248] sm:$0xf0]  ;;  %v4052_v30 = vld [vmem:[#allocation5 + $0x468] sm:$0xf]  ;;  %v5180_v32 = vld [vmem:[#allocation5 + $0x470] sm:$0xf0]  ;;  %v3681_v36 = vor.u32 %v5087_v25, %v3680_v23  ;;  %v3957_v40 = vor.u32 %v5156_v29, %v3956_v28 }
  0x26   :  { %2729 = vmatpush.bf16.msra.mxu0 %v3513_v4  ;;  %v4148_v33 = vld [vmem:[#allocation5 + $0x528] sm:$0xf]  ;;  %v5204_v34 = vld [vmem:[#allocation5 + $0x530] sm:$0xf0]  ;;  %v3777_v39 = vor.u32 %v5111_v27, %v3776_v26  ;;  %v3944_v41 = vld [vmem:[#allocation5 + $0x390] sm:$0xf]  ;;  %v4053_v43 = vor.u32 %v5180_v32, %v4052_v30 }
  0x27   :  { %2743 = vmatpush.bf16.msra.mxu1 %v3609_v5  ;;  %v4244_v37 = vld [vmem:[#allocation5 + $0x5e8] sm:$0xf]  ;;  %v5228_v38 = vld [vmem:[#allocation5 + $0x5f0] sm:$0xf0]  ;;  %v5153_v42 = vld [vmem:[#allocation5 + $0x398] sm:$0xf0]  ;;  %v4149_v44 = vor.u32 %v5204_v34, %v4148_v33 }
  0x28   :  { %2757 = vmatpush.bf16.msra.mxu2 %v3705_v6  ;;  %v4040_v45 = vld [vmem:[#allocation5 + $0x450] sm:$0xf]  ;;  %v5177_v46 = vld [vmem:[#allocation5 + $0x458] sm:$0xf0]  ;;  %v4245_v48 = vor.u32 %v5228_v38, %v4244_v37  ;;  %v3424_v52 = vld [vmem:[#allocation2] sm:$0xf]  ;;  %v3945_v55 = vor.u32 %v5153_v42, %v3944_v41 }
  0x29   :  { %2771 = vmatpush.bf16.msra.mxu3 %v3801_v10  ;;  %v4136_v47 = vld [vmem:[#allocation5 + $0x510] sm:$0xf]  ;;  %v5201_v49 = vld [vmem:[#allocation5 + $0x518] sm:$0xf0]  ;;  %v5030_v53 = vld [vmem:[#allocation2 + $0x3c] sm:$0xf0]  ;;  %v4041_v60 = vor.u32 %v5177_v46, %v4040_v45 }
  0x2a   :  { %2730 = vmatpush.bf16.msra.mxu0 %v3501_v16  ;;  %v4232_v50 = vld [vmem:[#allocation5 + $0x5d0] sm:$0xf]  ;;  %v5225_v51 = vld [vmem:[#allocation5 + $0x5d8] sm:$0xf0]  ;;  %v3432_v54 = vld [vmem:[#allocation2 + $0x8] sm:$0xf]  ;;  %v5574_v58 = vor.u32 %v5030_v53, %v3424_v52  ;;  %v4137_v61 = vor.u32 %v5201_v49, %v4136_v47 }
  0x2b   :  { %2744 = vmatpush.bf16.msra.mxu1 %v3597_v19  ;;  %v3932_v56 = vld [vmem:[#allocation5 + $0x378] sm:$0xf]  ;;  %v5150_v57 = vld [vmem:[#allocation5 + $0x380] sm:$0xf0]  ;;  %v5031_v59 = vld [vmem:[#allocation2 + $0x44] sm:$0xf0]  ;;  %v4233_v2 = vor.u32 %v5225_v51, %v4232_v50 }
  0x2c   :  { %2758 = vmatpush.bf16.msra.mxu2 %v3693_v20  ;;  %v4028_v62 = vld [vmem:[#allocation5 + $0x438] sm:$0xf]  ;;  %v5174_v63 = vld [vmem:[#allocation5 + $0x440] sm:$0xf0]  ;;  %v5576_v1 = vor.u32 %v5031_v59, %v3432_v54  ;;  %v5023_v8 = vld [vmem:[#allocation2 + $0xc] sm:$0xf]  ;;  %v3933_v9 = vor.u32 %v5150_v57, %v3932_v56 }
  0x2d   :  { %2772 = vmatpush.bf16.msra.mxu3 %v3789_v24  ;;  %v4124_v0 = vld [vmem:[#allocation5 + $0x4f8] sm:$0xf]  ;;  %v5198_v3 = vld [vmem:[#allocation5 + $0x500] sm:$0xf0]  ;;  %v3434_v11 = vld [vmem:[#allocation2 + $0x48] sm:$0xf0]  ;;  %v4029_v12 = vor.u32 %v5174_v63, %v4028_v62 }
  0x2e   :  { %2731 = vmatpush.bf16.msra.mxu0 %v3489_v31  ;;  %v4220_v4 = vld [vmem:[#allocation5 + $0x5b8] sm:$0xf]  ;;  %v5222_v5 = vld [vmem:[#allocation5 + $0x5c0] sm:$0xf0]  ;;  %v4125_v13 = vor.u32 %v5198_v3, %v4124_v0  ;;  %v3920_v14 = vld [vmem:[#allocation5 + $0x360] sm:$0xf]  ;;  %v5582_v17 = vor.u32 %v5023_v8, %v3434_v11 }
  0x2f   :  { %2745 = vmatpush.bf16.msra.mxu1 %v3585_v35  ;;  %v5022_v6 = vld [vmem:[#allocation2 + $0x4] sm:$0xf]  ;;  %v5147_v15 = vld [vmem:[#allocation5 + $0x368] sm:$0xf0]  ;;  %v4016_v16 = vld [vmem:[#allocation5 + $0x420] sm:$0xf]  ;;  %v4221_v18 = vor.u32 %v5222_v5, %v4220_v4 }
  0x30   :  { %2759 = vmatpush.bf16.msra.mxu2 %v3681_v36  ;;  %v3426_v7 = vld [vmem:[#allocation2 + $0x40] sm:$0xf0]  ;;  %v5171_v19 = vld [vmem:[#allocation5 + $0x428] sm:$0xf0]  ;;  %v4112_v20 = vld [vmem:[#allocation5 + $0x4e0] sm:$0xf]  ;;  %v3921_v24 = vor.u32 %v5147_v15, %v3920_v14 }
  0x31   :  { %2773 = vmatpush.bf16.msra.mxu3 %v3777_v39  ;;  %2732 = vmatmul.bf16.vlgmr.msra.gmra.mxu0 %v5574_v58  ;;  %v5580_v10 = vor.u32 %v5022_v6, %v3426_v7  ;;  %v5195_v21 = vld [vmem:[#allocation5 + $0x4e8] sm:$0xf0]  ;;  %v4208_v22 = vld [vmem:[#allocation5 + $0x5a0] sm:$0xf]  ;;  %v4017_v25 = vor.u32 %v5171_v19, %v4016_v16  ;;  %v3908_v27 = vld [vmem:[#allocation5 + $0x348] sm:$0xf] }
  0x32   :  { %2780 = vmatpush.bf16.msrb.mxu0 %v3957_v40  ;;  %v5219_v23 = vld [vmem:[#allocation5 + $0x5a8] sm:$0xf0]  ;;  %v4113_v26 = vor.u32 %v5195_v21, %v4112_v20  ;;  %v5144_v28 = vld [vmem:[#allocation5 + $0x350] sm:$0xf0]  ;;  %v4004_v29 = vld [vmem:[#allocation5 + $0x408] sm:$0xf] }
  0x33   :  { %2794 = vmatpush.bf16.msrb.mxu1 %v4053_v43  ;;  %2760 = vmatmul.bf16.vlgmr.msra.gmra.mxu2 %v5576_v1  ;;  %v4209_v30 = vor.u32 %v5219_v23, %v4208_v22  ;;  %v5168_v31 = vld [vmem:[#allocation5 + $0x410] sm:$0xf0]  ;;  %v4100_v32 = vld [vmem:[#allocation5 + $0x4c8] sm:$0xf]  ;;  %v3909_v36 = vor.u32 %v5144_v28, %v3908_v27  ;;  %v3896_v39 = vld [vmem:[#allocation5 + $0x330] sm:$0xf] }
  0x34   :  { %2808 = vmatpush.bf16.msrb.mxu2 %v4149_v44  ;;  %2746 = vmatmul.bf16.vlgmr.msra.gmra.mxu1 %v5580_v10  ;;  %v5192_v33 = vld [vmem:[#allocation5 + $0x4d0] sm:$0xf0]  ;;  %v4196_v34 = vld [vmem:[#allocation5 + $0x588] sm:$0xf]  ;;  %v4005_v37 = vor.u32 %v5168_v31, %v4004_v29  ;;  %v5141_v40 = vld [vmem:[#allocation5 + $0x338] sm:$0xf0] }
  0x35   :  { %2822 = vmatpush.bf16.msrb.mxu3 %v4245_v48  ;;  %v5216_v35 = vld [vmem:[#allocation5 + $0x590] sm:$0xf0]  ;;  %v4101_v38 = vor.u32 %v5192_v33, %v4100_v32  ;;  %v3992_v41 = vld [vmem:[#allocation5 + $0x3f0] sm:$0xf]  ;;  %v5165_v43 = vld [vmem:[#allocation5 + $0x3f8] sm:$0xf0]  ;;  %v3897_v48 = vor.u32 %v5141_v40, %v3896_v39 }
  0x36   :  { %2781 = vmatpush.bf16.msrb.mxu0 %v3945_v55  ;;  %2774 = vmatmul.bf16.vlgmr.msra.gmra.mxu3 %v5582_v17  ;;  %v4197_v42 = vor.u32 %v5216_v35, %v4196_v34  ;;  %v4088_v44 = vld [vmem:[#allocation5 + $0x4b0] sm:$0xf]  ;;  %v5189_v45 = vld [vmem:[#allocation5 + $0x4b8] sm:$0xf0]  ;;  %v3884_v49 = vld [vmem:[#allocation5 + $0x318] sm:$0xf]  ;;  %v3993_v50 = vor.u32 %v5165_v43, %v3992_v41 }
  0x37   :  { %2795 = vmatpush.bf16.msrb.mxu1 %v4041_v60  ;;  %v4184_v46 = vld [vmem:[#allocation5 + $0x570] sm:$0xf]  ;;  %v5213_v47 = vld [vmem:[#allocation5 + $0x578] sm:$0xf0]  ;;  %v4089_v51 = vor.u32 %v5189_v45, %v4088_v44  ;;  %v5138_v52 = vld [vmem:[#allocation5 + $0x320] sm:$0xf0] }
  0x38   :  { %2809 = vmatpush.bf16.msrb.mxu2 %v4137_v61  ;;  %v3980_v53 = vld [vmem:[#allocation5 + $0x3d8] sm:$0xf]  ;;  %v5162_v54 = vld [vmem:[#allocation5 + $0x3e0] sm:$0xf0]  ;;  %v4185_v55 = vor.u32 %v5213_v47, %v4184_v46  ;;  %v3872_v61 = vld [vmem:[#allocation5 + $0x300] sm:$0xf]  ;;  %v3885_v63 = vor.u32 %v5138_v52, %v3884_v49 }
  0x39   :  { %2823 = vmatpush.bf16.msrb.mxu3 %v4233_v2  ;;  %v4076_v56 = vld [vmem:[#allocation5 + $0x498] sm:$0xf]  ;;  %v5186_v57 = vld [vmem:[#allocation5 + $0x4a0] sm:$0xf0]  ;;  %v5135_v62 = vld [vmem:[#allocation5 + $0x308] sm:$0xf0]  ;;  %v3981_v5 = vor.u32 %v5162_v54, %v3980_v53 }
  0x3a   :  { %2782 = vmatpush.bf16.msrb.mxu0 %v3933_v9  ;;  %v4172_v59 = vld [vmem:[#allocation5 + $0x558] sm:$0xf]  ;;  %v5210_v60 = vld [vmem:[#allocation5 + $0x560] sm:$0xf0]  ;;  %v3968_v0 = vld [vmem:[#allocation5 + $0x3c0] sm:$0xf]  ;;  %v4077_v6 = vor.u32 %v5186_v57, %v4076_v56  ;;  %v3873_v19 = vor.u32 %v5135_v62, %v3872_v61 }
  0x3b   :  { %2796 = vmatpush.bf16.msrb.mxu1 %v4029_v12  ;;  %v5159_v2 = vld [vmem:[#allocation5 + $0x3c8] sm:$0xf0]  ;;  %v4064_v3 = vld [vmem:[#allocation5 + $0x480] sm:$0xf]  ;;  %v4340_v9 = vld [vmem:[#allocation5 + $0x6a8] sm:$0xf]  ;;  %v4173_v11 = vor.u32 %v5210_v60, %v4172_v59 }
  0x3c   :  { %2810 = vmatpush.bf16.msrb.mxu2 %v4125_v13  ;;  %v5183_v4 = vld [vmem:[#allocation5 + $0x488] sm:$0xf0]  ;;  %v4160_v7 = vld [vmem:[#allocation5 + $0x540] sm:$0xf]  ;;  %v5252_v12 = vld [vmem:[#allocation5 + $0x6b0] sm:$0xf0]  ;;  %v3969_v23 = vor.u32 %v5159_v2, %v3968_v0 }
  0x3d   :  { %2824 = vmatpush.bf16.msrb.mxu3 %v4221_v18  ;;  %v5207_v8 = vld [vmem:[#allocation5 + $0x548] sm:$0xf0]  ;;  %v4436_v13 = vld [vmem:[#allocation5 + $0x768] sm:$0xf]  ;;  %v5276_v14 = vld [vmem:[#allocation5 + $0x770] sm:$0xf0]  ;;  %v4341_v29 = vor.u32 %v5252_v12, %v4340_v9 }
  0x3e   :  { %2783 = vmatpush.bf16.msrb.mxu0 %v3921_v24  ;;  %v4532_v15 = vld [vmem:[#allocation5 + $0x828] sm:$0xf]  ;;  %v5300_v16 = vld [vmem:[#allocation5 + $0x830] sm:$0xf0]  ;;  %v3440_v21 = vld [vmem:[#allocation2 + $0x10] sm:$0xf]  ;;  %v4065_v24 = vor.u32 %v5183_v4, %v4064_v3  ;;  %v4161_v28 = vor.u32 %v5207_v8, %v4160_v7  ;;  %v4437_v33 = vor.u32 %v5276_v14, %v4436_v13 }
  0x3f   :  { %2797 = vmatpush.bf16.msrb.mxu1 %v4017_v25  ;;  %v4628_v18 = vld [vmem:[#allocation5 + $0x8e8] sm:$0xf]  ;;  %v5324_v20 = vld [vmem:[#allocation5 + $0x8f0] sm:$0xf0]  ;;  %v5032_v22 = vld [vmem:[#allocation2 + $0x4c] sm:$0xf0]  ;;  %v4533_v34 = vor.u32 %v5300_v16, %v4532_v15 }
  0x40   :  { %2811 = vmatpush.bf16.msrb.mxu2 %v4113_v26  ;;  %v3448_v25 = vld [vmem:[#allocation2 + $0x18] sm:$0xf]  ;;  %v5024_v27 = vld [vmem:[#allocation2 + $0x14] sm:$0xf]  ;;  %v5025_v31 = vld [vmem:[#allocation2 + $0x1c] sm:$0xf]  ;;  %v5586_v39 = vor.u32 %v5032_v22, %v3440_v21 }
  0x41   :  { %2825 = vmatpush.bf16.msrb.mxu3 %v4209_v30  ;;  %v5033_v26 = vld [vmem:[#allocation2 + $0x54] sm:$0xf0]  ;;  %v3442_v30 = vld [vmem:[#allocation2 + $0x50] sm:$0xf0]  ;;  %v3450_v32 = vld [vmem:[#allocation2 + $0x58] sm:$0xf0] }
  0x42   :  { %2784 = vmatpush.bf16.msrb.mxu0 %v3909_v36  ;;  %v4328_v35 = vld [vmem:[#allocation5 + $0x690] sm:$0xf]  ;;  %v5249_v36 = vld [vmem:[#allocation5 + $0x698] sm:$0xf0]  ;;  %v5588_v43 = vor.u32 %v5033_v26, %v3448_v25  ;;  %v5590_v44 = vor.u32 %v5024_v27, %v3442_v30  ;;  %v5592_v47 = vor.u32 %v5025_v31, %v3450_v32  ;;  %v5246_v52 = vld [vmem:[#allocation5 + $0x680] sm:$0xf0] }
  0x43   :  { %2798 = vmatpush.bf16.msrb.mxu1 %v4005_v37  ;;  %v4424_v37 = vld [vmem:[#allocation5 + $0x750] sm:$0xf]  ;;  %v5273_v40 = vld [vmem:[#allocation5 + $0x758] sm:$0xf0]  ;;  %v4412_v53 = vld [vmem:[#allocation5 + $0x738] sm:$0xf] }
  0x44   :  { %2812 = vmatpush.bf16.msrb.mxu2 %v4101_v38  ;;  %v4629_v38 = vor.u32 %v5324_v20, %v4628_v18  ;;  %v4520_v41 = vld [vmem:[#allocation5 + $0x810] sm:$0xf]  ;;  %v5321_v46 = vld [vmem:[#allocation5 + $0x8d8] sm:$0xf0]  ;;  %v4425_v49 = vor.u32 %v5273_v40, %v4424_v37  ;;  %v4508_v56 = vld [vmem:[#allocation5 + $0x7f8] sm:$0xf] }
  0x45   :  { %2826 = vmatpush.bf16.msrb.mxu3 %v4197_v42  ;;  %v5297_v42 = vld [vmem:[#allocation5 + $0x818] sm:$0xf0]  ;;  %v4616_v45 = vld [vmem:[#allocation5 + $0x8d0] sm:$0xf]  ;;  %v5294_v57 = vld [vmem:[#allocation5 + $0x800] sm:$0xf0] }
  0x46   :  { %2785 = vmatpush.bf16.msrb.mxu0 %v3897_v48  ;;  %v4329_v48 = vor.u32 %v5249_v36, %v4328_v35  ;;  %v4617_v54 = vor.u32 %v5321_v46, %v4616_v45  ;;  %v4604_v59 = vld [vmem:[#allocation5 + $0x8b8] sm:$0xf]  ;;  %v5318_v60 = vld [vmem:[#allocation5 + $0x8c0] sm:$0xf0]  ;;  %v4304_v0 = vld [vmem:[#allocation5 + $0x660] sm:$0xf] }
  0x47   :  { %2799 = vmatpush.bf16.msrb.mxu1 %v3993_v50  ;;  %v4521_v50 = vor.u32 %v5297_v42, %v4520_v41  ;;  %v5243_v2 = vld [vmem:[#allocation5 + $0x668] sm:$0xf0]  ;;  %v4400_v3 = vld [vmem:[#allocation5 + $0x720] sm:$0xf]  ;;  %v4605_v4 = vor.u32 %v5318_v60, %v4604_v59  ;;  %v4292_v14 = vld [vmem:[#allocation5 + $0x648] sm:$0xf] }
  0x48   :  { %2813 = vmatpush.bf16.msrb.mxu2 %v4089_v51  ;;  %v4316_v51 = vld [vmem:[#allocation5 + $0x678] sm:$0xf]  ;;  %v5291_v7 = vld [vmem:[#allocation5 + $0x7e8] sm:$0xf0]  ;;  %v4592_v8 = vld [vmem:[#allocation5 + $0x8a0] sm:$0xf] }
  0x49   :  { %2827 = vmatpush.bf16.msrb.mxu3 %v4185_v55  ;;  %v5270_v55 = vld [vmem:[#allocation5 + $0x740] sm:$0xf0]  ;;  %v4317_v61 = vor.u32 %v5246_v52, %v4316_v51  ;;  %v5315_v9 = vld [vmem:[#allocation5 + $0x8a8] sm:$0xf0]  ;;  %v5240_v15 = vld [vmem:[#allocation5 + $0x650] sm:$0xf0] }
  0x4a   :  { %2786 = vmatpush.bf16.msrb.mxu0 %v3885_v63  ;;  %v4413_v62 = vor.u32 %v5270_v55, %v4412_v53  ;;  %v4509_v63 = vor.u32 %v5294_v57, %v4508_v56  ;;  %v4388_v16 = vld [vmem:[#allocation5 + $0x708] sm:$0xf]  ;;  %v4593_v18 = vor.u32 %v5315_v9, %v4592_v8  ;;  %v5288_v21 = vld [vmem:[#allocation5 + $0x7d0] sm:$0xf0]  ;;  %v4280_v27 = vld [vmem:[#allocation5 + $0x630] sm:$0xf] }
  0x4b   :  { %2800 = vmatpush.bf16.msrb.mxu1 %v3981_v5  ;;  %v5267_v5 = vld [vmem:[#allocation5 + $0x728] sm:$0xf0]  ;;  %v4484_v20 = vld [vmem:[#allocation5 + $0x7c8] sm:$0xf]  ;;  %v5261_v31 = vld [vmem:[#allocation5 + $0x6f8] sm:$0xf0] }
  0x4c   :  { %2814 = vmatpush.bf16.msrb.mxu2 %v4077_v6  ;;  %v4496_v6 = vld [vmem:[#allocation5 + $0x7e0] sm:$0xf]  ;;  %v4401_v12 = vor.u32 %v5267_v5, %v4400_v3  ;;  %v4580_v22 = vld [vmem:[#allocation5 + $0x888] sm:$0xf]  ;;  %v4485_v26 = vor.u32 %v5288_v21, %v4484_v20  ;;  %v4472_v32 = vld [vmem:[#allocation5 + $0x7b0] sm:$0xf] }
  0x4d   :  { %2828 = vmatpush.bf16.msrb.mxu3 %v4173_v11  ;;  %v4305_v11 = vor.u32 %v5243_v2, %v4304_v0  ;;  %v4497_v13 = vor.u32 %v5291_v7, %v4496_v6  ;;  %v5309_v35 = vld [vmem:[#allocation5 + $0x878] sm:$0xf0]  ;;  %v4268_v37 = vld [vmem:[#allocation5 + $0x618] sm:$0xf]  ;;  %v5234_v41 = vld [vmem:[#allocation5 + $0x620] sm:$0xf0] }
  0x4e   :  { %2787 = vmatpush.bf16.msrb.mxu0 %v3873_v19  ;;  %v5264_v19 = vld [vmem:[#allocation5 + $0x710] sm:$0xf0]  ;;  %v4364_v42 = vld [vmem:[#allocation5 + $0x6d8] sm:$0xf]  ;;  %v5258_v45 = vld [vmem:[#allocation5 + $0x6e0] sm:$0xf0] }
  0x4f   :  { %2801 = vmatpush.bf16.msrb.mxu1 %v3969_v23  ;;  %v5312_v23 = vld [vmem:[#allocation5 + $0x890] sm:$0xf0]  ;;  %v4389_v25 = vor.u32 %v5264_v19, %v4388_v16  ;;  %v5306_v51 = vld [vmem:[#allocation5 + $0x860] sm:$0xf0]  ;;  %v4256_v52 = vld [vmem:[#allocation5 + $0x600] sm:$0xf]  ;;  %v4365_v60 = vor.u32 %v5258_v45, %v4364_v42 }
  0x50   :  { %2815 = vmatpush.bf16.msrb.mxu2 %v4065_v24  ;;  %v4293_v24 = vor.u32 %v5240_v15, %v4292_v14  ;;  %v4581_v30 = vor.u32 %v5312_v23, %v4580_v22  ;;  %v5231_v53 = vld [vmem:[#allocation5 + $0x608] sm:$0xf0]  ;;  %v4352_v55 = vld [vmem:[#allocation5 + $0x6c0] sm:$0xf]  ;;  %v4724_v0 = vld [vmem:[#allocation5 + $0x9a8] sm:$0xf] }
  0x51   :  { %2829 = vmatpush.bf16.msrb.mxu3 %v4161_v28  ;;  %2788 = vmatmul.bf16.vlgmr.msrb.gmra.mxu0 %v5586_v39  ;;  %v5237_v28 = vld [vmem:[#allocation5 + $0x638] sm:$0xf0]  ;;  %v5255_v56 = vld [vmem:[#allocation5 + $0x6c8] sm:$0xf0]  ;;  %v4448_v57 = vld [vmem:[#allocation5 + $0x780] sm:$0xf]  ;;  %v4257_v9 = vor.u32 %v5231_v53, %v4256_v52 }
  0x52   :  { %2836 = vmatpush.bf16.msra.mxu0 %v4341_v29  ;;  %2802 = vmatmul.bf16.vlgmr.msrb.gmra.mxu1 %v5590_v44  ;;  %v4376_v29 = vld [vmem:[#allocation5 + $0x6f0] sm:$0xf]  ;;  %v4281_v36 = vor.u32 %v5237_v28, %v4280_v27  ;;  %v5279_v59 = vld [vmem:[#allocation5 + $0x788] sm:$0xf0]  ;;  %v5348_v3 = vld [vmem:[#allocation5 + $0x9b0] sm:$0xf0]  ;;  %v4353_v14 = vor.u32 %v5255_v56, %v4352_v55 }
  0x53   :  { %2850 = vmatpush.bf16.msra.mxu1 %v4437_v33  ;;  %2816 = vmatmul.bf16.vlgmr.msrb.gmra.mxu2 %v5588_v43  ;;  %v5285_v33 = vld [vmem:[#allocation5 + $0x7b8] sm:$0xf0]  ;;  %v5372_v5 = vld [vmem:[#allocation5 + $0xa70] sm:$0xf0]  ;;  %v4916_v6 = vld [vmem:[#allocation5 + $0xb28] sm:$0xf]  ;;  %v4449_v15 = vor.u32 %v5279_v59, %v4448_v57  ;;  %v4725_v21 = vor.u32 %v5348_v3, %v4724_v0 }
  0x54   :  { %2864 = vmatpush.bf16.msra.mxu2 %v4533_v34  ;;  %2830 = vmatmul.bf16.vlgmr.msrb.gmra.mxu3 %v5592_v47  ;;  %v4568_v34 = vld [vmem:[#allocation5 + $0x870] sm:$0xf]  ;;  %v4473_v40 = vor.u32 %v5285_v33, %v4472_v32  ;;  %v5396_v7 = vld [vmem:[#allocation5 + $0xb30] sm:$0xf0]  ;;  %v5012_v8 = vld [vmem:[#allocation5 + $0xbe8] sm:$0xf] }
  0x55   :  { %2878 = vmatpush.bf16.msra.mxu3 %v4629_v38  ;;  %v4377_v38 = vor.u32 %v5261_v31, %v4376_v29  ;;  %v4569_v46 = vor.u32 %v5309_v35, %v4568_v34  ;;  %v3464_v16 = vld [vmem:[#allocation2 + $0x28] sm:$0xf]  ;;  %v5026_v19 = vld [vmem:[#allocation2 + $0x24] sm:$0xf]  ;;  %v5027_v23 = vld [vmem:[#allocation2 + $0x2c] sm:$0xf] }
  0x56   :  { %2837 = vmatpush.bf16.msra.mxu0 %v4329_v48  ;;  %v4460_v48 = vld [vmem:[#allocation5 + $0x798] sm:$0xf]  ;;  %v3458_v22 = vld [vmem:[#allocation2 + $0x60] sm:$0xf0]  ;;  %v4712_v27 = vld [vmem:[#allocation5 + $0x990] sm:$0xf] }
  0x57   :  { %2851 = vmatpush.bf16.msra.mxu1 %v4425_v49  ;;  %v5282_v49 = vld [vmem:[#allocation5 + $0x7a0] sm:$0xf0]  ;;  %v5345_v28 = vld [vmem:[#allocation5 + $0x998] sm:$0xf0]  ;;  %v4808_v29 = vld [vmem:[#allocation5 + $0xa50] sm:$0xf] }
  0x58   :  { %2865 = vmatpush.bf16.msra.mxu2 %v4521_v50  ;;  %v4556_v50 = vld [vmem:[#allocation5 + $0x858] sm:$0xf]  ;;  %v5369_v32 = vld [vmem:[#allocation5 + $0xa58] sm:$0xf0]  ;;  %v4904_v33 = vld [vmem:[#allocation5 + $0xb10] sm:$0xf] }
  0x59   :  { %2879 = vmatpush.bf16.msra.mxu3 %v4617_v54  ;;  %v4269_v54 = vor.u32 %v5234_v41, %v4268_v37  ;;  %v4557_v2 = vor.u32 %v5306_v51, %v4556_v50  ;;  %v5393_v34 = vld [vmem:[#allocation5 + $0xb18] sm:$0xf0]  ;;  %v5000_v37 = vld [vmem:[#allocation5 + $0xbd0] sm:$0xf]  ;;  %v4713_v41 = vor.u32 %v5345_v28, %v4712_v27  ;;  %v4809_v42 = vor.u32 %v5369_v32, %v4808_v29  ;;  %v5366_v51 = vld [vmem:[#allocation5 + $0xa40] sm:$0xf0] }
  0x5a   :  { %2838 = vmatpush.bf16.msra.mxu0 %v4317_v61  ;;  %v4461_v61 = vor.u32 %v5282_v49, %v4460_v48  ;;  %v4905_v45 = vor.u32 %v5393_v34, %v4904_v33  ;;  %v5342_v48 = vld [vmem:[#allocation5 + $0x980] sm:$0xf0]  ;;  %v4796_v49 = vld [vmem:[#allocation5 + $0xa38] sm:$0xf]  ;;  %v5363_v0 = vld [vmem:[#allocation5 + $0xa28] sm:$0xf0] }
  0x5b   :  { %2852 = vmatpush.bf16.msra.mxu1 %v4413_v62  ;;  %v4544_v62 = vld [vmem:[#allocation5 + $0x840] sm:$0xf]  ;;  %v4892_v52 = vld [vmem:[#allocation5 + $0xaf8] sm:$0xf]  ;;  %v5390_v53 = vld [vmem:[#allocation5 + $0xb00] sm:$0xf0]  ;;  %v4797_v57 = vor.u32 %v5366_v51, %v4796_v49 }
  0x5c   :  { %2866 = vmatpush.bf16.msra.mxu2 %v4509_v63  ;;  %v5303_v63 = vld [vmem:[#allocation5 + $0x848] sm:$0xf0]  ;;  %v5414_v55 = vld [vmem:[#allocation5 + $0xbc0] sm:$0xf0]  ;;  %v4893_v59 = vor.u32 %v5390_v53, %v4892_v52  ;;  %v5357_v27 = vld [vmem:[#allocation5 + $0x9f8] sm:$0xf0] }
  0x5d   :  { %2880 = vmatpush.bf16.msra.mxu3 %v4605_v4  ;;  %v4820_v4 = vld [vmem:[#allocation5 + $0xa68] sm:$0xf]  ;;  %v4545_v20 = vor.u32 %v5303_v63, %v4544_v62  ;;  %v4784_v62 = vld [vmem:[#allocation5 + $0xa20] sm:$0xf]  ;;  %v5387_v3 = vld [vmem:[#allocation5 + $0xae8] sm:$0xf0] }
  0x5e   :  { %2839 = vmatpush.bf16.msra.mxu0 %v4305_v11  ;;  %v5420_v11 = vld [vmem:[#allocation5 + $0xbf0] sm:$0xf0]  ;;  %v4856_v28 = vld [vmem:[#allocation5 + $0xab0] sm:$0xf]  ;;  %v5381_v29 = vld [vmem:[#allocation5 + $0xab8] sm:$0xf0] }
  0x5f   :  { %2853 = vmatpush.bf16.msra.mxu1 %v4401_v12  ;;  %v3456_v12 = vld [vmem:[#allocation2 + $0x20] sm:$0xf]  ;;  %v5405_v32 = vld [vmem:[#allocation5 + $0xb78] sm:$0xf0]  ;;  %v4652_v34 = vld [vmem:[#allocation5 + $0x918] sm:$0xf] }
  0x60   :  { %2867 = vmatpush.bf16.msra.mxu2 %v4497_v13  ;;  %v5034_v13 = vld [vmem:[#allocation2 + $0x5c] sm:$0xf0]  ;;  %v5378_v49 = vld [vmem:[#allocation5 + $0xaa0] sm:$0xf0]  ;;  %v5327_v53 = vld [vmem:[#allocation5 + $0x908] sm:$0xf0] }
  0x61   :  { %2881 = vmatpush.bf16.msra.mxu3 %v4593_v18  ;;  %v5035_v18 = vld [vmem:[#allocation2 + $0x64] sm:$0xf0]  ;;  %v5598_v31 = vor.u32 %v5034_v13, %v3456_v12  ;;  %v5402_v51 = vld [vmem:[#allocation5 + $0xb60] sm:$0xf0]  ;;  %v4640_v52 = vld [vmem:[#allocation5 + $0x900] sm:$0xf] }
  0x62   :  { %2840 = vmatpush.bf16.msra.mxu0 %v4293_v24  ;;  %v3466_v24 = vld [vmem:[#allocation2 + $0x68] sm:$0xf0]  ;;  %v5600_v35 = vor.u32 %v5035_v18, %v3464_v16  ;;  %v4772_v12 = vld [vmem:[#allocation5 + $0xa08] sm:$0xf]  ;;  %v5384_v16 = vld [vmem:[#allocation5 + $0xad0] sm:$0xf0] }
  0x63   :  { %2854 = vmatpush.bf16.msra.mxu1 %v4389_v25  ;;  %v4821_v25 = vor.u32 %v5372_v5, %v4820_v4  ;;  %v4976_v4 = vld [vmem:[#allocation5 + $0xba0] sm:$0xf]  ;;  %v5411_v5 = vld [vmem:[#allocation5 + $0xba8] sm:$0xf0]  ;;  %v4964_v18 = vld [vmem:[#allocation5 + $0xb88] sm:$0xf] }
  0x64   :  { %2868 = vmatpush.bf16.msra.mxu2 %v4485_v26  ;;  %v4917_v26 = vor.u32 %v5396_v7, %v4916_v6  ;;  %v4785_v7 = vor.u32 %v5363_v0, %v4784_v62  ;;  %v4977_v13 = vor.u32 %v5411_v5, %v4976_v4  ;;  %v4928_v62 = vld [vmem:[#allocation5 + $0xb40] sm:$0xf]  ;;  %v5059_v0 = vld [vmem:[#allocation5 + $0xac] sm:$0xf]  ;;  %v3670_v5 = vld [vmem:[#allocation5 + $0x174] sm:$0xf0] }
  0x65   :  { %2882 = vmatpush.bf16.msra.mxu3 %v4581_v30  ;;  %v5013_v30 = vor.u32 %v5420_v11, %v5012_v8  ;;  %v5336_v11 = vld [vmem:[#allocation5 + $0x950] sm:$0xf0]  ;;  %v5083_v4 = vld [vmem:[#allocation5 + $0x16c] sm:$0xf]  ;;  %s5542_s0 = smov [#allocation8]   ;;  %s3408_s5 = sshll.u32 %s5750_s3, 4  ;;  %s3409_s5 = int_to_ptr.hbm [resolvable:$true] %s3408_s5 }
  0x66   :  { %2841 = vmatpush.bf16.msra.mxu0 %v4281_v36  ;;  %v5602_v36 = vor.u32 %v5026_v19, %v3458_v22  ;;  %v5408_v19 = vld [vmem:[#allocation5 + $0xb90] sm:$0xf0]  ;;  %s3406_s2 = sshll.u32 %s5542_s0, 4  ;;  %s5543_s6 = smov 384   ;;  %s3407_s2 = int_to_ptr.vmem [resolvable:$true] %s3406_s2 }
  0x67   :  { %2855 = vmatpush.bf16.msra.mxu1 %v4377_v38  ;;  %v5417_v38 = vld [vmem:[#allocation5 + $0xbd8] sm:$0xf0]  ;;  %s5544_s7 = smov 24  }
  0x68   :  { %2869 = vmatpush.bf16.msra.mxu2 %v4473_v40  ;;  %v5604_v40 = vor.u32 %v5027_v23, %v3466_v24  ;;  %v5001_v50 = vor.u32 %v5417_v38, %v5000_v37  ;;  %v4664_v23 = vld [vmem:[#allocation5 + $0x930] sm:$0xf]  ;;  %v5333_v24 = vld [vmem:[#allocation5 + $0x938] sm:$0xf0]  ;;  %v4857_v38 = vor.u32 %v5381_v29, %v4856_v28  ;;  %v3562_v28 = vld [vmem:[#allocation5 + $0x9c] sm:$0xf0] }
  0x69   :  { %2883 = vmatpush.bf16.msra.mxu3 %v4569_v46  ;;  %v4700_v46 = vld [vmem:[#allocation5 + $0x978] sm:$0xf]  ;;  %v4665_v33 = vor.u32 %v5333_v24, %v4664_v23  ;;  %v5029_v23 = vld [vmem:[#allocation2 + $0x3c] sm:$0xf]  ;;  %v5080_v29 = vld [vmem:[#allocation5 + $0x154] sm:$0xf] }
  0x6a   :  { %2842 = vmatpush.bf16.msra.mxu0 %v4269_v54  ;;  %v4988_v54 = vld [vmem:[#allocation5 + $0xbb8] sm:$0xf]  ;;  %v4701_v56 = vor.u32 %v5342_v48, %v4700_v46  ;;  %v3482_v24 = vld [vmem:[#allocation2 + $0x78] sm:$0xf0] }
  0x6b   :  { %2856 = vmatpush.bf16.msra.mxu1 %v4365_v60  ;;  %v4688_v60 = vld [vmem:[#allocation5 + $0x960] sm:$0xf]  ;;  %v4989_v63 = vor.u32 %v5414_v55, %v4988_v54  ;;  %v4844_v48 = vld [vmem:[#allocation5 + $0xa98] sm:$0xf] }
  0x6c   :  { %2870 = vmatpush.bf16.msra.mxu2 %v4461_v61  ;;  %v5339_v61 = vld [vmem:[#allocation5 + $0x968] sm:$0xf0]  ;;  %v4736_v55 = vld [vmem:[#allocation5 + $0x9c0] sm:$0xf] }
  0x6d   :  { %2884 = vmatpush.bf16.msra.mxu3 %v4557_v2  ;;  %v4880_v2 = vld [vmem:[#allocation5 + $0xae0] sm:$0xf]  ;;  %v4689_v6 = vor.u32 %v5339_v61, %v4688_v60  ;;  %v4845_v61 = vor.u32 %v5378_v49, %v4844_v48 }
  0x6e   :  { %2843 = vmatpush.bf16.msra.mxu0 %v4257_v9  ;;  %v4881_v8 = vor.u32 %v5387_v3, %v4880_v2  ;;  %v4676_v9 = vld [vmem:[#allocation5 + $0x948] sm:$0xf]  ;;  %v3574_v3 = vld [vmem:[#allocation5 + $0xb4] sm:$0xf0] }
  0x6f   :  { %2857 = vmatpush.bf16.msra.mxu1 %v4353_v14  ;;  %v5360_v14 = vld [vmem:[#allocation5 + $0xa10] sm:$0xf0] }
  0x70   :  { %2871 = vmatpush.bf16.msra.mxu2 %v4449_v15  ;;  %v4868_v15 = vld [vmem:[#allocation5 + $0xac8] sm:$0xf] }
  0x71   :  { %2885 = vmatpush.bf16.msra.mxu3 %v4545_v20  ;;  %2844 = vmatmul.bf16.vlgmr.msra.gmra.mxu0 %v5598_v31  ;;  %v4677_v20 = vor.u32 %v5336_v11, %v4676_v9  ;;  %v4869_v22 = vor.u32 %v5384_v16, %v4868_v15  ;;  %v4641_v9 = vor.u32 %v5327_v53, %v4640_v52  ;;  %v3862_v11 = vld [vmem:[#allocation5 + $0x2f4] sm:$0xf0]  ;;  %v3550_v52 = vld [vmem:[#allocation5 + $0x84] sm:$0xf0]  ;;  %v5077_v53 = vld [vmem:[#allocation5 + $0x13c] sm:$0xf] }
  0x72   :  { %2892 = vmatpush.bf16.msrb.mxu0 %v4725_v21  ;;  %2858 = vmatmul.bf16.vlgmr.msra.gmra.mxu1 %v5602_v36  ;;  %v4773_v21 = vor.u32 %v5360_v14, %v4772_v12  ;;  %v3472_v12 = vld [vmem:[#allocation2 + $0x30] sm:$0xf]  ;;  %v3480_v16 = vld [vmem:[#allocation2 + $0x38] sm:$0xf] }
  0x73   :  { %2906 = vmatpush.bf16.msrb.mxu1 %v4821_v25  ;;  %2872 = vmatmul.bf16.vlgmr.msra.gmra.mxu2 %v5600_v35  ;;  %v4760_v25 = vld [vmem:[#allocation5 + $0x9f0] sm:$0xf] }
  0x74   :  { %2920 = vmatpush.bf16.msrb.mxu2 %v4917_v26  ;;  %2886 = vmatmul.bf16.vlgmr.msra.gmra.mxu3 %v5604_v40  ;;  %v4965_v26 = vor.u32 %v5408_v19, %v4964_v18  ;;  %v4761_v37 = vor.u32 %v5357_v27, %v4760_v25  ;;  %v5037_v18 = vld [vmem:[#allocation2 + $0x74] sm:$0xf0]  ;;  %v5028_v19 = vld [vmem:[#allocation2 + $0x34] sm:$0xf]  ;;  %v3673_v25 = vor.u32 %v5083_v4, %v3670_v5  ;;  %v3634_v5 = vld [vmem:[#allocation5 + $0x12c] sm:$0xf0] }
  0x75   :  { %2934 = vmatpush.bf16.msrb.mxu3 %v5013_v30  ;;  %v4952_v30 = vld [vmem:[#allocation5 + $0xb70] sm:$0xf]  ;;  %v5056_v27 = vld [vmem:[#allocation5 + $0x94] sm:$0xf] }
  0x76   :  { %2893 = vmatpush.bf16.msrb.mxu0 %v4713_v41  ;;  %v5330_v41 = vld [vmem:[#allocation5 + $0x920] sm:$0xf0]  ;;  %v4953_v46 = vor.u32 %v5405_v32, %v4952_v30  ;;  %v3565_v48 = vor.u32 %v5056_v27, %v3562_v28  ;;  %v5044_v27 = vld [vmem:[#allocation5 + $0x34] sm:$0xf]  ;;  %v3514_v28 = vld [vmem:[#allocation5 + $0x3c] sm:$0xf0] }
  0x77   :  { %2907 = vmatpush.bf16.msrb.mxu1 %v4809_v42  ;;  %v4748_v42 = vld [vmem:[#allocation5 + $0x9d8] sm:$0xf]  ;;  %v4653_v54 = vor.u32 %v5330_v41, %v4652_v34  ;;  %v5104_v34 = vld [vmem:[#allocation5 + $0x214] sm:$0xf] }
  0x78   :  { %2921 = vmatpush.bf16.msrb.mxu2 %v4905_v45  ;;  %v5354_v45 = vld [vmem:[#allocation5 + $0x9e0] sm:$0xf0] }
  0x79   :  { %2935 = vmatpush.bf16.msrb.mxu3 %v5001_v50  ;;  %v4940_v50 = vld [vmem:[#allocation5 + $0xb58] sm:$0xf]  ;;  %v4749_v60 = vor.u32 %v5354_v45, %v4748_v42  ;;  %v5128_v42 = vld [vmem:[#allocation5 + $0x2d4] sm:$0xf]  ;;  %v3850_v45 = vld [vmem:[#allocation5 + $0x2dc] sm:$0xf0] }
  0x7a   :  { %2894 = vmatpush.bf16.msrb.mxu0 %v4701_v56  ;;  %v5351_v56 = vld [vmem:[#allocation5 + $0x9c8] sm:$0xf0]  ;;  %v4941_v2 = vor.u32 %v5402_v51, %v4940_v50  ;;  %v5053_v51 = vld [vmem:[#allocation5 + $0x7c] sm:$0xf] }
  0x7b   :  { %2908 = vmatpush.bf16.msrb.mxu1 %v4797_v57  ;;  %v4832_v57 = vld [vmem:[#allocation5 + $0xa80] sm:$0xf]  ;;  %v4737_v14 = vor.u32 %v5351_v56, %v4736_v55  ;;  %v3646_v55 = vld [vmem:[#allocation5 + $0x144] sm:$0xf0]  ;;  %v5101_v56 = vld [vmem:[#allocation5 + $0x1fc] sm:$0xf] }
  0x7c   :  { %2922 = vmatpush.bf16.msrb.mxu2 %v4893_v59  ;;  %v5375_v59 = vld [vmem:[#allocation5 + $0xa88] sm:$0xf0] }
  0x7d   :  { %2936 = vmatpush.bf16.msrb.mxu3 %v4989_v63  ;;  %v5399_v63 = vld [vmem:[#allocation5 + $0xb48] sm:$0xf0]  ;;  %v4833_v15 = vor.u32 %v5375_v59, %v4832_v57  ;;  %v3742_v57 = vld [vmem:[#allocation5 + $0x204] sm:$0xf0]  ;;  %v5125_v59 = vld [vmem:[#allocation5 + $0x2bc] sm:$0xf] }
  0x7e   :  { %2895 = vmatpush.bf16.msrb.mxu0 %v4689_v6  ;;  %v5107_v6 = vld [vmem:[#allocation5 + $0x22c] sm:$0xf] }
  0x7f   :  { %2909 = vmatpush.bf16.msrb.mxu1 %v4785_v7  ;;  %v3766_v7 = vld [vmem:[#allocation5 + $0x234] sm:$0xf0] }
  0x80   :  { %2923 = vmatpush.bf16.msrb.mxu2 %v4881_v8  ;;  %v5131_v8 = vld [vmem:[#allocation5 + $0x2ec] sm:$0xf] }
  0x81   :  { %2937 = vmatpush.bf16.msrb.mxu3 %v4977_v13  ;;  %v5036_v13 = vld [vmem:[#allocation2 + $0x6c] sm:$0xf0]  ;;  %v3865_v30 = vor.u32 %v5131_v8, %v3862_v11  ;;  %v5122_v8 = vld [vmem:[#allocation5 + $0x2a4] sm:$0xf] }
  0x82   :  { %2896 = vmatpush.bf16.msrb.mxu0 %v4677_v20  ;;  %v4929_v20 = vor.u32 %v5399_v63, %v4928_v62  ;;  %v5610_v32 = vor.u32 %v5036_v13, %v3472_v12  ;;  %v3649_v62 = vor.u32 %v5077_v53, %v3646_v55  ;;  %v3745_v63 = vor.u32 %v5101_v56, %v3742_v57  ;;  %v5065_v53 = vld [vmem:[#allocation5 + $0xdc] sm:$0xf]  ;;  %v3598_v55 = vld [vmem:[#allocation5 + $0xe4] sm:$0xf0] }
  0x83   :  { %2910 = vmatpush.bf16.msrb.mxu1 %v4773_v21  ;;  %v3577_v21 = vor.u32 %v5059_v0, %v3574_v3  ;;  %v5050_v0 = vld [vmem:[#allocation5 + $0x64] sm:$0xf]  ;;  %v5089_v56 = vld [vmem:[#allocation5 + $0x19c] sm:$0xf]  ;;  %v3694_v57 = vld [vmem:[#allocation5 + $0x1a4] sm:$0xf0] }
  0x84   :  { %2924 = vmatpush.bf16.msrb.mxu2 %v4869_v22  ;;  %v3474_v22 = vld [vmem:[#allocation2 + $0x70] sm:$0xf0]  ;;  %v5074_v3 = vld [vmem:[#allocation5 + $0x124] sm:$0xf] }
  0x85   :  { %2938 = vmatpush.bf16.msrb.mxu3 %v4965_v26  ;;  %v3769_v26 = vor.u32 %v5107_v6, %v3766_v7  ;;  %v5614_v41 = vor.u32 %v5028_v19, %v3474_v22  ;;  %v5098_v6 = vld [vmem:[#allocation5 + $0x1e4] sm:$0xf]  ;;  %v3730_v7 = vld [vmem:[#allocation5 + $0x1ec] sm:$0xf0]  ;;  %v3637_v12 = vor.u32 %v5074_v3, %v3634_v5  ;;  %v3622_v19 = vld [vmem:[#allocation5 + $0x114] sm:$0xf0] }
  0x86   :  { %2897 = vmatpush.bf16.msrb.mxu0 %v4665_v33  ;;  %v3658_v33 = vld [vmem:[#allocation5 + $0x15c] sm:$0xf0]  ;;  %v3733_v13 = vor.u32 %v5098_v6, %v3730_v7  ;;  %v5119_v22 = vld [vmem:[#allocation5 + $0x28c] sm:$0xf]  ;;  %v5062_v3 = vld [vmem:[#allocation5 + $0xc4] sm:$0xf] }
  0x87   :  { %2911 = vmatpush.bf16.msrb.mxu1 %v4761_v37  ;;  %v3754_v37 = vld [vmem:[#allocation5 + $0x21c] sm:$0xf0]  ;;  %v3661_v49 = vor.u32 %v5080_v29, %v3658_v33  ;;  %v5068_v29 = vld [vmem:[#allocation5 + $0xf4] sm:$0xf]  ;;  %v5086_v5 = vld [vmem:[#allocation5 + $0x184] sm:$0xf] }
  0x88   :  { %2925 = vmatpush.bf16.msrb.mxu2 %v4857_v38  ;;  %v5612_v38 = vor.u32 %v5037_v18, %v3480_v16  ;;  %v3757_v50 = vor.u32 %v5104_v34, %v3754_v37  ;;  %v5071_v16 = vld [vmem:[#allocation5 + $0x10c] sm:$0xf]  ;;  %v3610_v33 = vld [vmem:[#allocation5 + $0xfc] sm:$0xf0]  ;;  %v5092_v34 = vld [vmem:[#allocation5 + $0x1b4] sm:$0xf] }
  0x89   :  { %2939 = vmatpush.bf16.msrb.mxu3 %v4953_v46  ;;  %v5616_v46 = vor.u32 %v5029_v23, %v3482_v24  ;;  %v3814_v23 = vld [vmem:[#allocation5 + $0x294] sm:$0xf0]  ;;  %v3706_v37 = vld [vmem:[#allocation5 + $0x1bc] sm:$0xf0]  ;;  %v3682_v7 = vld [vmem:[#allocation5 + $0x18c] sm:$0xf0] }
  0x8a   :  { %2898 = vmatpush.bf16.msrb.mxu0 %v4653_v54  ;;  %v3853_v54 = vor.u32 %v5128_v42, %v3850_v45  ;;  %v5116_v42 = vld [vmem:[#allocation5 + $0x274] sm:$0xf]  ;;  %v3802_v45 = vld [vmem:[#allocation5 + $0x27c] sm:$0xf0] }
  0x8b   :  { %2912 = vmatpush.bf16.msrb.mxu1 %v4749_v60  ;;  %v3838_v60 = vld [vmem:[#allocation5 + $0x2c4] sm:$0xf0] }
  0x8c   :  { %2926 = vmatpush.bf16.msrb.mxu2 %v4845_v61  ;;  %v3553_v61 = vor.u32 %v5053_v51, %v3550_v52  ;;  %v3841_v4 = vor.u32 %v5125_v59, %v3838_v60  ;;  %v5041_v51 = vld [vmem:[#allocation5 + $0x1c] sm:$0xf]  ;;  %v3502_v52 = vld [vmem:[#allocation5 + $0x24] sm:$0xf0] }
  0x8d   :  { %2940 = vmatpush.bf16.msrb.mxu3 %v4941_v2  ;;  %v3538_v2 = vld [vmem:[#allocation5 + $0x6c] sm:$0xf0]  ;;  %v5113_v59 = vld [vmem:[#allocation5 + $0x25c] sm:$0xf]  ;;  %v3790_v60 = vld [vmem:[#allocation5 + $0x264] sm:$0xf0] }
  0x8e   :  { %2899 = vmatpush.bf16.msrb.mxu0 %v4641_v9  ;;  %v3826_v9 = vld [vmem:[#allocation5 + $0x2ac] sm:$0xf0]  ;;  %v3541_v11 = vor.u32 %v5050_v0, %v3538_v2  ;;  %v3601_v0 = vor.u32 %v5065_v53, %v3598_v55  ;;  %v3697_v2 = vor.u32 %v5089_v56, %v3694_v57  ;;  %v3793_v6 = vor.u32 %v5113_v59, %v3790_v60  ;;  %v5173_v53 = vld [vmem:[#allocation5 + $0x43c] sm:$0xf]  ;;  %v4030_v55 = vld [vmem:[#allocation5 + $0x444] sm:$0xf0] }
  0x8f   :  { %2913 = vmatpush.bf16.msrb.mxu1 %v4737_v14  ;;  %v5047_v14 = vld [vmem:[#allocation5 + $0x4c] sm:$0xf]  ;;  %v3829_v18 = vor.u32 %v5122_v8, %v3826_v9  ;;  %v5110_v8 = vld [vmem:[#allocation5 + $0x244] sm:$0xf]  ;;  %v3778_v9 = vld [vmem:[#allocation5 + $0x24c] sm:$0xf0] }
  0x90   :  { %2927 = vmatpush.bf16.msrb.mxu2 %v4833_v15  ;;  %v3526_v15 = vld [vmem:[#allocation5 + $0x54] sm:$0xf0]  ;;  %v5197_v56 = vld [vmem:[#allocation5 + $0x4fc] sm:$0xf]  ;;  %v4126_v57 = vld [vmem:[#allocation5 + $0x504] sm:$0xf0] }
  0x91   :  { %2941 = vmatpush.bf16.msrb.mxu3 %v4929_v20  ;;  %2900 = vmatmul.bf16.vlgmr.msrb.gmra.mxu0 %v5610_v32  ;;  %v5095_v20 = vld [vmem:[#allocation5 + $0x1cc] sm:$0xf]  ;;  %v3529_v24 = vor.u32 %v5047_v14, %v3526_v15  ;;  %v4054_v15 = vld [vmem:[#allocation5 + $0x474] sm:$0xf0]  ;;  %v5221_v59 = vld [vmem:[#allocation5 + $0x5bc] sm:$0xf] }
  0x92   :  { %2948 = vmatpush.bf16.msra.mxu0 %v3577_v21  ;;  %2914 = vmatmul.bf16.vlgmr.msrb.gmra.mxu1 %v5614_v41  ;;  %v3718_v21 = vld [vmem:[#allocation5 + $0x1d4] sm:$0xf0]  ;;  %v4222_v60 = vld [vmem:[#allocation5 + $0x5c4] sm:$0xf0] }
  0x93   :  { %2962 = vmatpush.bf16.msra.mxu1 %v3673_v25  ;;  %2928 = vmatmul.bf16.vlgmr.msrb.gmra.mxu2 %v5612_v38  ;;  %v3625_v25 = vor.u32 %v5071_v16, %v3622_v19  ;;  %v5203_v16 = vld [vmem:[#allocation5 + $0x52c] sm:$0xf] }
  0x94   :  { %2976 = vmatpush.bf16.msra.mxu2 %v3769_v26  ;;  %2942 = vmatmul.bf16.vlgmr.msrb.gmra.mxu3 %v5616_v46  ;;  %v3721_v26 = vor.u32 %v5095_v20, %v3718_v21  ;;  %v3685_v20 = vor.u32 %v5086_v5, %v3682_v7  ;;  %v5227_v21 = vld [vmem:[#allocation5 + $0x5ec] sm:$0xf]  ;;  %v4018_v5 = vld [vmem:[#allocation5 + $0x42c] sm:$0xf0] }
  0x95   :  { %2990 = vmatpush.bf16.msra.mxu3 %v3865_v30  ;;  %v3817_v30 = vor.u32 %v5119_v22, %v3814_v23  ;;  %v4246_v22 = vld [vmem:[#allocation5 + $0x5f4] sm:$0xf0]  ;;  %v3781_v23 = vor.u32 %v5110_v8, %v3778_v9  ;;  %v4114_v7 = vld [vmem:[#allocation5 + $0x4ec] sm:$0xf0]  ;;  %v5218_v8 = vld [vmem:[#allocation5 + $0x5a4] sm:$0xf] }
  0x96   :  { %2949 = vmatpush.bf16.msra.mxu0 %v3565_v48  ;;  %v3517_v48 = vor.u32 %v5044_v27, %v3514_v28  ;;  %v5152_v27 = vld [vmem:[#allocation5 + $0x394] sm:$0xf]  ;;  %v3946_v28 = vld [vmem:[#allocation5 + $0x39c] sm:$0xf0]  ;;  %v4210_v9 = vld [vmem:[#allocation5 + $0x5ac] sm:$0xf0] }
  0x97   :  { %2963 = vmatpush.bf16.msra.mxu1 %v3661_v49  ;;  %v3613_v49 = vor.u32 %v5068_v29, %v3610_v33  ;;  %v5176_v29 = vld [vmem:[#allocation5 + $0x454] sm:$0xf]  ;;  %v4042_v33 = vld [vmem:[#allocation5 + $0x45c] sm:$0xf0] }
  0x98   :  { %2977 = vmatpush.bf16.msra.mxu2 %v3757_v50  ;;  %v3709_v50 = vor.u32 %v5092_v34, %v3706_v37  ;;  %v5200_v34 = vld [vmem:[#allocation5 + $0x514] sm:$0xf]  ;;  %v4138_v37 = vld [vmem:[#allocation5 + $0x51c] sm:$0xf0] }
  0x99   :  { %2991 = vmatpush.bf16.msra.mxu3 %v3853_v54  ;;  %v3805_v54 = vor.u32 %v5116_v42, %v3802_v45  ;;  %v5224_v42 = vld [vmem:[#allocation5 + $0x5d4] sm:$0xf]  ;;  %v4234_v45 = vld [vmem:[#allocation5 + $0x5dc] sm:$0xf0] }
  0x9a   :  { %2950 = vmatpush.bf16.msra.mxu0 %v3553_v61  ;;  %v3505_v61 = vor.u32 %v5041_v51, %v3502_v52  ;;  %v5149_v51 = vld [vmem:[#allocation5 + $0x37c] sm:$0xf]  ;;  %v3934_v52 = vld [vmem:[#allocation5 + $0x384] sm:$0xf0] }
  0x9b   :  { %2964 = vmatpush.bf16.msra.mxu1 %v3649_v62  ;;  %v5038_v62 = vld [vmem:[#allocation5 + $0x4] sm:$0xf] }
  0x9c   :  { %2978 = vmatpush.bf16.msra.mxu2 %v3745_v63  ;;  %v3490_v63 = vld [vmem:[#allocation5 + $0xc] sm:$0xf0] }
  0x9d   :  { %2992 = vmatpush.bf16.msra.mxu3 %v3841_v4  ;;  %v3586_v4 = vld [vmem:[#allocation5 + $0xcc] sm:$0xf0]  ;;  %v3493_v14 = vor.u32 %v5038_v62, %v3490_v63  ;;  %v4033_v62 = vor.u32 %v5173_v53, %v4030_v55  ;;  %v4129_v63 = vor.u32 %v5197_v56, %v4126_v57  ;;  %v5161_v53 = vld [vmem:[#allocation5 + $0x3dc] sm:$0xf]  ;;  %v3982_v55 = vld [vmem:[#allocation5 + $0x3e4] sm:$0xf0] }
  0x9e   :  { %2951 = vmatpush.bf16.msra.mxu0 %v3541_v11  ;;  %v5155_v11 = vld [vmem:[#allocation5 + $0x3ac] sm:$0xf]  ;;  %v3589_v19 = vor.u32 %v5062_v3, %v3586_v4  ;;  %v5170_v3 = vld [vmem:[#allocation5 + $0x424] sm:$0xf]  ;;  %v4225_v4 = vor.u32 %v5221_v59, %v4222_v60  ;;  %v5185_v56 = vld [vmem:[#allocation5 + $0x49c] sm:$0xf] }
  0x9f   :  { %2965 = vmatpush.bf16.msra.mxu1 %v3637_v12  ;;  %v3958_v12 = vld [vmem:[#allocation5 + $0x3b4] sm:$0xf0]  ;;  %v4078_v57 = vld [vmem:[#allocation5 + $0x4a4] sm:$0xf0]  ;;  %v5209_v59 = vld [vmem:[#allocation5 + $0x55c] sm:$0xf] }
  0xa0   :  { %2979 = vmatpush.bf16.msra.mxu2 %v3733_v13  ;;  %v5179_v13 = vld [vmem:[#allocation5 + $0x46c] sm:$0xf]  ;;  %v4174_v60 = vld [vmem:[#allocation5 + $0x564] sm:$0xf0] }
  0xa1   :  { %2993 = vmatpush.bf16.msra.mxu3 %v3829_v18  ;;  %v4150_v18 = vld [vmem:[#allocation5 + $0x534] sm:$0xf0] }
  0xa2   :  { %2952 = vmatpush.bf16.msra.mxu0 %v3529_v24  ;;  %v3961_v24 = vor.u32 %v5155_v11, %v3958_v12  ;;  %v4021_v12 = vor.u32 %v5170_v3, %v4018_v5  ;;  %v5158_v3 = vld [vmem:[#allocation5 + $0x3c4] sm:$0xf] }
  0xa3   :  { %2966 = vmatpush.bf16.msra.mxu1 %v3625_v25  ;;  %v4057_v25 = vor.u32 %v5179_v13, %v4054_v15  ;;  %v3910_v15 = vld [vmem:[#allocation5 + $0x354] sm:$0xf0]  ;;  %v5182_v5 = vld [vmem:[#allocation5 + $0x484] sm:$0xf] }
  0xa4   :  { %2980 = vmatpush.bf16.msra.mxu2 %v3721_v26  ;;  %v4153_v26 = vor.u32 %v5203_v16, %v4150_v18  ;;  %v5167_v16 = vld [vmem:[#allocation5 + $0x40c] sm:$0xf]  ;;  %v4213_v18 = vor.u32 %v5218_v8, %v4210_v9  ;;  %v5206_v8 = vld [vmem:[#allocation5 + $0x544] sm:$0xf]  ;;  %v4162_v9 = vld [vmem:[#allocation5 + $0x54c] sm:$0xf0] }
  0xa5   :  { %2994 = vmatpush.bf16.msra.mxu3 %v3817_v30  ;;  %v4249_v30 = vor.u32 %v5227_v21, %v4246_v22  ;;  %v4102_v21 = vld [vmem:[#allocation5 + $0x4d4] sm:$0xf0]  ;;  %v5215_v22 = vld [vmem:[#allocation5 + $0x58c] sm:$0xf] }
  0xa6   :  { %2953 = vmatpush.bf16.msra.mxu0 %v3517_v48  ;;  %v3949_v48 = vor.u32 %v5152_v27, %v3946_v28  ;;  %v5140_v27 = vld [vmem:[#allocation5 + $0x334] sm:$0xf]  ;;  %v3898_v28 = vld [vmem:[#allocation5 + $0x33c] sm:$0xf0] }
  0xa7   :  { %2967 = vmatpush.bf16.msra.mxu1 %v3613_v49  ;;  %v4045_v49 = vor.u32 %v5176_v29, %v4042_v33  ;;  %v5164_v29 = vld [vmem:[#allocation5 + $0x3f4] sm:$0xf]  ;;  %v3994_v33 = vld [vmem:[#allocation5 + $0x3fc] sm:$0xf0] }
  0xa8   :  { %2981 = vmatpush.bf16.msra.mxu2 %v3709_v50  ;;  %v4141_v50 = vor.u32 %v5200_v34, %v4138_v37  ;;  %v5188_v34 = vld [vmem:[#allocation5 + $0x4b4] sm:$0xf]  ;;  %v4090_v37 = vld [vmem:[#allocation5 + $0x4bc] sm:$0xf0] }
  0xa9   :  { %2995 = vmatpush.bf16.msra.mxu3 %v3805_v54  ;;  %v4237_v54 = vor.u32 %v5224_v42, %v4234_v45  ;;  %v5212_v42 = vld [vmem:[#allocation5 + $0x574] sm:$0xf]  ;;  %v4186_v45 = vld [vmem:[#allocation5 + $0x57c] sm:$0xf0] }
  0xaa   :  { %2954 = vmatpush.bf16.msra.mxu0 %v3505_v61  ;;  %v3937_v61 = vor.u32 %v5149_v51, %v3934_v52  ;;  %v5137_v51 = vld [vmem:[#allocation5 + $0x31c] sm:$0xf]  ;;  %v3886_v52 = vld [vmem:[#allocation5 + $0x324] sm:$0xf0] }
  0xab   :  { %2968 = vmatpush.bf16.msra.mxu1 %v3601_v0  ;;  %v5146_v0 = vld [vmem:[#allocation5 + $0x364] sm:$0xf] }
  0xac   :  { %2982 = vmatpush.bf16.msra.mxu2 %v3697_v2  ;;  %v3922_v2 = vld [vmem:[#allocation5 + $0x36c] sm:$0xf0] }
  0xad   :  { %2996 = vmatpush.bf16.msra.mxu3 %v3793_v6  ;;  %v5194_v6 = vld [vmem:[#allocation5 + $0x4e4] sm:$0xf]  ;;  %v3925_v11 = vor.u32 %v5146_v0, %v3922_v2  ;;  %v3985_v0 = vor.u32 %v5161_v53, %v3982_v55  ;;  %v4081_v2 = vor.u32 %v5185_v56, %v4078_v57  ;;  %v5269_v53 = vld [vmem:[#allocation5 + $0x73c] sm:$0xf]  ;;  %v4414_v55 = vld [vmem:[#allocation5 + $0x744] sm:$0xf0] }
  0xae   :  { %2955 = vmatpush.bf16.msra.mxu0 %v3493_v14  ;;  %v4117_v13 = vor.u32 %v5194_v6, %v4114_v7  ;;  %v5143_v14 = vld [vmem:[#allocation5 + $0x34c] sm:$0xf]  ;;  %v4177_v6 = vor.u32 %v5209_v59, %v4174_v60  ;;  %v4066_v7 = vld [vmem:[#allocation5 + $0x48c] sm:$0xf0]  ;;  %v5293_v56 = vld [vmem:[#allocation5 + $0x7fc] sm:$0xf] }
  0xaf   :  { %2969 = vmatpush.bf16.msra.mxu1 %v3589_v19  ;;  %v4006_v19 = vld [vmem:[#allocation5 + $0x414] sm:$0xf0]  ;;  %v4510_v57 = vld [vmem:[#allocation5 + $0x804] sm:$0xf0]  ;;  %v5317_v59 = vld [vmem:[#allocation5 + $0x8bc] sm:$0xf] }
  0xb0   :  { %2983 = vmatpush.bf16.msra.mxu2 %v3685_v20  ;;  %v5191_v20 = vld [vmem:[#allocation5 + $0x4cc] sm:$0xf]  ;;  %v4606_v60 = vld [vmem:[#allocation5 + $0x8c4] sm:$0xf0] }
  0xb1   :  { %2997 = vmatpush.bf16.msra.mxu3 %v3781_v23  ;;  %2956 = vmatmul.bf16.vlgmr.msra.gmra.mxu0 %v5574_v58  ;;  %v4198_v23 = vld [vmem:[#allocation5 + $0x594] sm:$0xf0] }
  0xb2   :  { %3004 = vmatpush.bf16.msrb.mxu0 %v3961_v24  ;;  %2970 = vmatmul.bf16.vlgmr.msra.gmra.mxu1 %v5580_v10  ;;  %v3913_v24 = vor.u32 %v5143_v14, %v3910_v15  ;;  %v4438_v15 = vld [vmem:[#allocation5 + $0x774] sm:$0xf0] }
  0xb3   :  { %3018 = vmatpush.bf16.msrb.mxu1 %v4057_v25  ;;  %2984 = vmatmul.bf16.vlgmr.msra.gmra.mxu2 %v5576_v1  ;;  %v4009_v25 = vor.u32 %v5167_v16, %v4006_v19  ;;  %v5299_v16 = vld [vmem:[#allocation5 + $0x82c] sm:$0xf] }
  0xb4   :  { %3032 = vmatpush.bf16.msrb.mxu2 %v4153_v26  ;;  %2998 = vmatmul.bf16.vlgmr.msra.gmra.mxu3 %v5582_v17  ;;  %v4105_v26 = vor.u32 %v5191_v20, %v4102_v21  ;;  %v4069_v20 = vor.u32 %v5182_v5, %v4066_v7  ;;  %v5323_v21 = vld [vmem:[#allocation5 + $0x8ec] sm:$0xf]  ;;  %v4402_v5 = vld [vmem:[#allocation5 + $0x72c] sm:$0xf0] }
  0xb5   :  { %3046 = vmatpush.bf16.msrb.mxu3 %v4249_v30  ;;  %v4201_v30 = vor.u32 %v5215_v22, %v4198_v23  ;;  %v4630_v22 = vld [vmem:[#allocation5 + $0x8f4] sm:$0xf0]  ;;  %v4165_v23 = vor.u32 %v5206_v8, %v4162_v9  ;;  %v4498_v7 = vld [vmem:[#allocation5 + $0x7ec] sm:$0xf0]  ;;  %v5314_v8 = vld [vmem:[#allocation5 + $0x8a4] sm:$0xf] }
  0xb6   :  { %3005 = vmatpush.bf16.msrb.mxu0 %v3949_v48  ;;  %v3901_v48 = vor.u32 %v5140_v27, %v3898_v28  ;;  %v5248_v27 = vld [vmem:[#allocation5 + $0x694] sm:$0xf]  ;;  %v4330_v28 = vld [vmem:[#allocation5 + $0x69c] sm:$0xf0]  ;;  %v4594_v9 = vld [vmem:[#allocation5 + $0x8ac] sm:$0xf0] }
  0xb7   :  { %3019 = vmatpush.bf16.msrb.mxu1 %v4045_v49  ;;  %v3997_v49 = vor.u32 %v5164_v29, %v3994_v33  ;;  %v5272_v29 = vld [vmem:[#allocation5 + $0x754] sm:$0xf]  ;;  %v4426_v33 = vld [vmem:[#allocation5 + $0x75c] sm:$0xf0] }
  0xb8   :  { %3033 = vmatpush.bf16.msrb.mxu2 %v4141_v50  ;;  %v4093_v50 = vor.u32 %v5188_v34, %v4090_v37  ;;  %v5296_v34 = vld [vmem:[#allocation5 + $0x814] sm:$0xf]  ;;  %v4522_v37 = vld [vmem:[#allocation5 + $0x81c] sm:$0xf0] }
  0xb9   :  { %3047 = vmatpush.bf16.msrb.mxu3 %v4237_v54  ;;  %v4189_v54 = vor.u32 %v5212_v42, %v4186_v45  ;;  %v5320_v42 = vld [vmem:[#allocation5 + $0x8d4] sm:$0xf]  ;;  %v4618_v45 = vld [vmem:[#allocation5 + $0x8dc] sm:$0xf0] }
  0xba   :  { %3006 = vmatpush.bf16.msrb.mxu0 %v3937_v61  ;;  %v3889_v61 = vor.u32 %v5137_v51, %v3886_v52  ;;  %v5245_v51 = vld [vmem:[#allocation5 + $0x67c] sm:$0xf]  ;;  %v4318_v52 = vld [vmem:[#allocation5 + $0x684] sm:$0xf0] }
  0xbb   :  { %3020 = vmatpush.bf16.msrb.mxu1 %v4033_v62  ;;  %v5134_v62 = vld [vmem:[#allocation5 + $0x304] sm:$0xf] }
  0xbc   :  { %3034 = vmatpush.bf16.msrb.mxu2 %v4129_v63  ;;  %v3874_v63 = vld [vmem:[#allocation5 + $0x30c] sm:$0xf0] }
  0xbd   :  { %3048 = vmatpush.bf16.msrb.mxu3 %v4225_v4  ;;  %v3970_v4 = vld [vmem:[#allocation5 + $0x3cc] sm:$0xf0]  ;;  %v3877_v14 = vor.u32 %v5134_v62, %v3874_v63  ;;  %v4417_v62 = vor.u32 %v5269_v53, %v4414_v55  ;;  %v4513_v63 = vor.u32 %v5293_v56, %v4510_v57  ;;  %v4270_v55 = vld [vmem:[#allocation5 + $0x624] sm:$0xf0]  ;;  %v5257_v56 = vld [vmem:[#allocation5 + $0x6dc] sm:$0xf]  ;;  %v5636_v57 = vpop.f32.mrf.mxu2 }
  0xbe   :  { %3007 = vmatpush.bf16.msrb.mxu0 %v3925_v11  ;;  %v5251_v11 = vld [vmem:[#allocation5 + $0x6ac] sm:$0xf]  ;;  %v3973_v19 = vor.u32 %v5158_v3, %v3970_v4  ;;  %v5266_v3 = vld [vmem:[#allocation5 + $0x724] sm:$0xf]  ;;  %v4609_v4 = vor.u32 %v5317_v59, %v4606_v60  ;;  %v4366_v60 = vld [vmem:[#allocation5 + $0x6e4] sm:$0xf0] }
  0xbf   :  { %3021 = vmatpush.bf16.msrb.mxu1 %v4021_v12  ;;  %v4342_v12 = vld [vmem:[#allocation5 + $0x6b4] sm:$0xf0] }
  0xc0   :  { %3035 = vmatpush.bf16.msrb.mxu2 %v4117_v13  ;;  %v5275_v13 = vld [vmem:[#allocation5 + $0x76c] sm:$0xf] }
  0xc1   :  { %3049 = vmatpush.bf16.msrb.mxu3 %v4213_v18  ;;  %v4534_v18 = vld [vmem:[#allocation5 + $0x834] sm:$0xf0] }
  0xc2   :  { %3008 = vmatpush.bf16.msrb.mxu0 %v3913_v24  ;;  %v4345_v24 = vor.u32 %v5251_v11, %v4342_v12  ;;  %v4405_v12 = vor.u32 %v5266_v3, %v4402_v5  ;;  %v5230_v5 = vld [vmem:[#allocation5 + $0x604] sm:$0xf] }
  0xc3   :  { %3022 = vmatpush.bf16.msrb.mxu1 %v4009_v25  ;;  %v4441_v25 = vor.u32 %v5275_v13, %v4438_v15  ;;  %v4294_v15 = vld [vmem:[#allocation5 + $0x654] sm:$0xf0] }
  0xc4   :  { %3036 = vmatpush.bf16.msrb.mxu2 %v4105_v26  ;;  %v4537_v26 = vor.u32 %v5299_v16, %v4534_v18  ;;  %v5263_v16 = vld [vmem:[#allocation5 + $0x70c] sm:$0xf]  ;;  %v4597_v18 = vor.u32 %v5314_v8, %v4594_v9  ;;  %v4369_v8 = vor.u32 %v5257_v56, %v4366_v60  ;;  %v4810_v56 = vld [vmem:[#allocation5 + $0xa5c] sm:$0xf0] }
  0xc5   :  { %3050 = vmatpush.bf16.msrb.mxu3 %v4201_v30  ;;  %v4633_v30 = vor.u32 %v5323_v21, %v4630_v22  ;;  %v4486_v21 = vld [vmem:[#allocation5 + $0x7d4] sm:$0xf0]  ;;  %v5630_v22 = vpop.f32.mrf.mxu0  ;;  %v4906_v60 = vld [vmem:[#allocation5 + $0xb1c] sm:$0xf0] }
  0xc6   :  { %3009 = vmatpush.bf16.msrb.mxu0 %v3901_v48  ;;  %v4333_v48 = vor.u32 %v5248_v27, %v4330_v28 }
  0xc7   :  { %3023 = vmatpush.bf16.msrb.mxu1 %v3997_v49  ;;  %v4429_v49 = vor.u32 %v5272_v29, %v4426_v33  ;;  %v5236_v29 = vld [vmem:[#allocation5 + $0x634] sm:$0xf] }
  0xc8   :  { %3037 = vmatpush.bf16.msrb.mxu2 %v4093_v50  ;;  %v4525_v50 = vor.u32 %v5296_v34, %v4522_v37  ;;  %v5260_v33 = vld [vmem:[#allocation5 + $0x6f4] sm:$0xf]  ;;  %v4378_v37 = vld [vmem:[#allocation5 + $0x6fc] sm:$0xf0] }
  0xc9   :  { %3051 = vmatpush.bf16.msrb.mxu3 %v4189_v54  ;;  %v4621_v54 = vor.u32 %v5320_v42, %v4618_v45  ;;  %v5284_v42 = vld [vmem:[#allocation5 + $0x7b4] sm:$0xf]  ;;  %v4474_v45 = vld [vmem:[#allocation5 + $0x7bc] sm:$0xf0] }
  0xca   :  { %3010 = vmatpush.bf16.msrb.mxu0 %v3889_v61  ;;  %v4321_v61 = vor.u32 %v5245_v51, %v4318_v52  ;;  %v4381_v52 = vor.u32 %v5260_v33, %v4378_v37  ;;  %v4477_v53 = vor.u32 %v5284_v42, %v4474_v45  ;;  %v5419_v33 = vld [vmem:[#allocation5 + $0xbec] sm:$0xf] }
  0xcb   :  { %3024 = vmatpush.bf16.msrb.mxu1 %v3985_v0  ;;  %v5242_v0 = vld [vmem:[#allocation5 + $0x664] sm:$0xf] }
  0xcc   :  { %3038 = vmatpush.bf16.msrb.mxu2 %v4081_v2  ;;  %v4306_v2 = vld [vmem:[#allocation5 + $0x66c] sm:$0xf0] }
  0xcd   :  { %3052 = vmatpush.bf16.msrb.mxu3 %v4177_v6  ;;  %v5290_v6 = vld [vmem:[#allocation5 + $0x7e4] sm:$0xf]  ;;  %v4309_v11 = vor.u32 %v5242_v0, %v4306_v2  ;;  %v5305_v0 = vld [vmem:[#allocation5 + $0x85c] sm:$0xf]  ;;  %v4558_v2 = vld [vmem:[#allocation5 + $0x864] sm:$0xf0] }
  0xce   :  { %3011 = vmatpush.bf16.msrb.mxu0 %v3877_v14  ;;  %v4501_v13 = vor.u32 %v5290_v6, %v4498_v7  ;;  %v5239_v14 = vld [vmem:[#allocation5 + $0x64c] sm:$0xf]  ;;  %v4258_v6 = vld [vmem:[#allocation5 + $0x60c] sm:$0xf0]  ;;  %v5641_v7 = vpop.f32.mrf.mxu0 }
  0xcf   :  { %3025 = vmatpush.bf16.msrb.mxu1 %v3973_v19  ;;  %v4390_v19 = vld [vmem:[#allocation5 + $0x714] sm:$0xf0] }
  0xd0   :  { %3039 = vmatpush.bf16.msrb.mxu2 %v4069_v20  ;;  %v5287_v20 = vld [vmem:[#allocation5 + $0x7cc] sm:$0xf]  ;;  %v4393_v27 = vor.u32 %v5263_v16, %v4390_v19  ;;  %v4450_v16 = vld [vmem:[#allocation5 + $0x78c] sm:$0xf0] }
  0xd1   :  { %3053 = vmatpush.bf16.msrb.mxu3 %v4165_v23  ;;  %3012 = vmatmul.bf16.vlgmr.msrb.gmra.mxu0 %v5586_v39  ;;  %v5311_v23 = vld [vmem:[#allocation5 + $0x88c] sm:$0xf]  ;;  %v4489_v28 = vor.u32 %v5287_v20, %v4486_v21  ;;  %v4546_v19 = vld [vmem:[#allocation5 + $0x84c] sm:$0xf0]  ;;  %v4726_v21 = vld [vmem:[#allocation5 + $0x9b4] sm:$0xf0] }
  0xd2   :  { %3060 = vmatpush.bf16.msra.mxu0 %v4345_v24  ;;  %3026 = vmatmul.bf16.vlgmr.msrb.gmra.mxu1 %v5590_v44  ;;  %v4582_v24 = vld [vmem:[#allocation5 + $0x894] sm:$0xf0]  ;;  %v5347_v20 = vld [vmem:[#allocation5 + $0x9ac] sm:$0xf] }
  0xd3   :  { %3074 = vmatpush.bf16.msra.mxu1 %v4441_v25  ;;  %3040 = vmatmul.bf16.vlgmr.msrb.gmra.mxu2 %v5588_v43  ;;  %v5632_v25 = vpop.f32.mrf.mxu1  ;;  %v4585_v34 = vor.u32 %v5311_v23, %v4582_v24  ;;  %v5371_v23 = vld [vmem:[#allocation5 + $0xa6c] sm:$0xf]  ;;  %v4261_v24 = vor.u32 %v5230_v5, %v4258_v6  ;;  %v4729_v42 = vor.u32 %v5347_v20, %v4726_v21 }
  0xd4   :  { %3088 = vmatpush.bf16.msra.mxu2 %v4537_v26  ;;  %3054 = vmatmul.bf16.vlgmr.msrb.gmra.mxu3 %v5592_v47  ;;  %v4297_v26 = vor.u32 %v5239_v14, %v4294_v15  ;;  %v4561_v15 = vor.u32 %v5305_v0, %v4558_v2  ;;  %v5002_v0 = vld [vmem:[#allocation5 + $0xbdc] sm:$0xf0] }
  0xd5   :  { %3102 = vmatpush.bf16.msra.mxu3 %v4633_v30  ;;  %v4282_v30 = vld [vmem:[#allocation5 + $0x63c] sm:$0xf0] }
  0xd6   :  { %3061 = vmatpush.bf16.msra.mxu0 %v4333_v48  ;;  %v5308_v48 = vld [vmem:[#allocation5 + $0x874] sm:$0xf]  ;;  %v4285_v51 = vor.u32 %v5236_v29, %v4282_v30 }
  0xd7   :  { %3075 = vmatpush.bf16.msra.mxu1 %v4429_v49  ;;  %v4570_v49 = vld [vmem:[#allocation5 + $0x87c] sm:$0xf0] }
  0xd8   :  { %3089 = vmatpush.bf16.msra.mxu2 %v4525_v50  ;;  %v5634_v50 = vld [vmem:[#allocation7] sm:$0x7]  ;;  %v4573_v59 = vor.u32 %v5308_v48, %v4570_v49 }
  0xd9   :  { %3103 = vmatpush.bf16.msra.mxu3 %v4621_v54  ;;  %v5233_v54 = vld [vmem:[#allocation5 + $0x61c] sm:$0xf]  ;;  %v590_v3 = vperm.slane %v5634_v50, 0 }
  0xda   :  { %3062 = vmatpush.bf16.msra.mxu0 %v4321_v61  ;;  %v5281_v61 = vld [vmem:[#allocation5 + $0x79c] sm:$0xf] }
  0xdb   :  { %3076 = vmatpush.bf16.msra.mxu1 %v4417_v62  ;;  %v4462_v62 = vld [vmem:[#allocation5 + $0x7a4] sm:$0xf0]  ;;  %v5643_v14 = vpop.f32.mrf.mxu1  ;;  %v2734_v45 = vadd.f32 %v5630_v22, %v590_v3 }
  0xdc   :  { %3090 = vmatpush.bf16.msra.mxu2 %v4513_v63  ;;  %v5638_v63 = vpop.f32.mrf.mxu3  ;;  %v4465_v9 = vor.u32 %v5281_v61, %v4462_v62  ;;  %v5416_v62 = vld [vmem:[#allocation5 + $0xbd4] sm:$0xf] }
  0xdd   :  { %3104 = vmatpush.bf16.msra.mxu3 %v4609_v4  ;;  %v4273_v4 = vor.u32 %v5233_v54, %v4270_v55  ;;  %v5648_v54 = vpop.f32.mrf.mxu2  ;;  %v2748_v2 = vadd.f32 %v5632_v25, %v2734_v45  ;;  %v5413_v25 = vld [vmem:[#allocation5 + $0xbbc] sm:$0xf]  ;;  %v4978_v45 = vld [vmem:[#allocation5 + $0xbac] sm:$0xf0] }
  0xde   :  { %3063 = vmatpush.bf16.msra.mxu0 %v4309_v11  ;;  %v5254_v11 = vld [vmem:[#allocation5 + $0x6c4] sm:$0xf] }
  0xdf   :  { %3077 = vmatpush.bf16.msra.mxu1 %v4405_v12  ;;  %v4354_v12 = vld [vmem:[#allocation5 + $0x6cc] sm:$0xf0]  ;;  %v2762_v21 = vadd.f32 %v5636_v57, %v2748_v2  ;;  %v4966_v2 = vld [vmem:[#allocation5 + $0xb94] sm:$0xf0] }
  0xe0   :  { %3091 = vmatpush.bf16.msra.mxu2 %v4501_v13  ;;  %v5278_v13 = vld [vmem:[#allocation5 + $0x784] sm:$0xf]  ;;  %v4357_v29 = vor.u32 %v5254_v11, %v4354_v12  ;;  %v5365_v11 = vld [vmem:[#allocation5 + $0xa3c] sm:$0xf] }
  0xe1   :  { %3105 = vmatpush.bf16.msra.mxu3 %v4597_v18  ;;  %v5302_v18 = vld [vmem:[#allocation5 + $0x844] sm:$0xf]  ;;  %v4453_v30 = vor.u32 %v5278_v13, %v4450_v16  ;;  %v5005_v13 = vor.u32 %v5416_v62, %v5002_v0  ;;  %v5389_v16 = vld [vmem:[#allocation5 + $0xafc] sm:$0xf] }
  0xe2   :  { %3064 = vmatpush.bf16.msra.mxu0 %v4297_v26  ;;  %v4822_v26 = vld [vmem:[#allocation5 + $0xa74] sm:$0xf0]  ;;  %v4549_v37 = vor.u32 %v5302_v18, %v4546_v19  ;;  %v4894_v18 = vld [vmem:[#allocation5 + $0xb04] sm:$0xf0] }
  0xe3   :  { %3078 = vmatpush.bf16.msra.mxu1 %v4393_v27  ;;  %v5395_v27 = vld [vmem:[#allocation5 + $0xb2c] sm:$0xf]  ;;  %v4825_v48 = vor.u32 %v5371_v23, %v4822_v26  ;;  %v5653_v12 = vpop.f32.mrf.mxu1  ;;  %v4990_v19 = vld [vmem:[#allocation5 + $0xbc4] sm:$0xf0]  ;;  %v5338_v26 = vld [vmem:[#allocation5 + $0x964] sm:$0xf] }
  0xe4   :  { %3092 = vmatpush.bf16.msra.mxu2 %v4489_v28  ;;  %v4918_v28 = vld [vmem:[#allocation5 + $0xb34] sm:$0xf0]  ;;  %v5650_v61 = vpop.f32.mrf.mxu3 }
  0xe5   :  { %3106 = vmatpush.bf16.msra.mxu3 %v4585_v34  ;;  %v5014_v34 = vld [vmem:[#allocation5 + $0xbf4] sm:$0xf0]  ;;  %v4921_v49 = vor.u32 %v5395_v27, %v4918_v28  ;;  %v4690_v27 = vld [vmem:[#allocation5 + $0x96c] sm:$0xf0]  ;;  %v5362_v28 = vld [vmem:[#allocation5 + $0xa24] sm:$0xf] }
  0xe6   :  { %3065 = vmatpush.bf16.msra.mxu0 %v4285_v51  ;;  %v5344_v51 = vld [vmem:[#allocation5 + $0x994] sm:$0xf]  ;;  %v5017_v55 = vor.u32 %v5419_v33, %v5014_v34  ;;  %v5386_v33 = vld [vmem:[#allocation5 + $0xae4] sm:$0xf]  ;;  %v4882_v34 = vld [vmem:[#allocation5 + $0xaec] sm:$0xf0]  ;;  %v4693_v57 = vor.u32 %v5338_v26, %v4690_v27 }
  0xe7   :  { %3079 = vmatpush.bf16.msra.mxu1 %v4381_v52  ;;  %v4714_v52 = vld [vmem:[#allocation5 + $0x99c] sm:$0xf0]  ;;  %v5329_v27 = vld [vmem:[#allocation5 + $0x91c] sm:$0xf] }
  0xe8   :  { %3093 = vmatpush.bf16.msra.mxu2 %v4477_v53  ;;  %v5368_v53 = vld [vmem:[#allocation5 + $0xa54] sm:$0xf]  ;;  %v4717_v22 = vor.u32 %v5344_v51, %v4714_v52 }
  0xe9   :  { %3107 = vmatpush.bf16.msra.mxu3 %v4573_v59  ;;  %v5392_v59 = vld [vmem:[#allocation5 + $0xb14] sm:$0xf]  ;;  %v4813_v5 = vor.u32 %v5368_v53, %v4810_v56  ;;  %v4885_v53 = vor.u32 %v5386_v33, %v4882_v34  ;;  %v4678_v56 = vld [vmem:[#allocation5 + $0x954] sm:$0xf0]  ;;  %v4750_v34 = vld [vmem:[#allocation5 + $0x9e4] sm:$0xf0] }
  0xea   :  { %3066 = vmatpush.bf16.msra.mxu0 %v4273_v4  ;;  %v2789_v4 = vpop.f32.mrf.mxu0  ;;  %v4909_v6 = vor.u32 %v5392_v59, %v4906_v60  ;;  %v5359_v59 = vld [vmem:[#allocation5 + $0xa0c] sm:$0xf]  ;;  %v4870_v60 = vld [vmem:[#allocation5 + $0xad4] sm:$0xf0] }
  0xeb   :  { %3080 = vmatpush.bf16.msra.mxu1 %v4369_v8  ;;  %v5341_v8 = vld [vmem:[#allocation5 + $0x97c] sm:$0xf] }
  0xec   :  { %3094 = vmatpush.bf16.msra.mxu2 %v4465_v9  ;;  %v4702_v9 = vld [vmem:[#allocation5 + $0x984] sm:$0xf0]  ;;  %v5666_v51 = vpop.f32.mrf.mxu3 }
  0xed   :  { %3108 = vmatpush.bf16.msra.mxu3 %v4561_v15  ;;  %v4798_v15 = vld [vmem:[#allocation5 + $0xa44] sm:$0xf0]  ;;  %v4705_v20 = vor.u32 %v5341_v8, %v4702_v9 }
  0xee   :  { %3067 = vmatpush.bf16.msra.mxu0 %v4261_v24  ;;  %v4801_v23 = vor.u32 %v5365_v11, %v4798_v15  ;;  %v4897_v24 = vor.u32 %v5389_v16, %v4894_v18  ;;  %v5332_v11 = vld [vmem:[#allocation5 + $0x934] sm:$0xf]  ;;  %v4762_v18 = vld [vmem:[#allocation5 + $0x9fc] sm:$0xf0] }
  0xef   :  { %3081 = vmatpush.bf16.msra.mxu1 %v4357_v29  ;;  %v4993_v29 = vor.u32 %v5413_v25, %v4990_v19  ;;  %v5356_v15 = vld [vmem:[#allocation5 + $0x9f4] sm:$0xf] }
  0xf0   :  { %3095 = vmatpush.bf16.msra.mxu2 %v4453_v30  ;;  %v4786_v30 = vld [vmem:[#allocation5 + $0xa2c] sm:$0xf0]  ;;  %v5380_v25 = vld [vmem:[#allocation5 + $0xab4] sm:$0xf] }
  0xf1   :  { %3109 = vmatpush.bf16.msra.mxu3 %v4549_v37  ;;  %3068 = vmatmul.bf16.vlgmr.msra.gmra.mxu0 %v5598_v31  ;;  %v2736_v37 = vadd.f32 %v5641_v7, %v590_v3  ;;  %v4789_v52 = vor.u32 %v5362_v28, %v4786_v30  ;;  %v4774_v3 = vld [vmem:[#allocation5 + $0xa14] sm:$0xf0]  ;;  %v5383_v7 = vld [vmem:[#allocation5 + $0xacc] sm:$0xf]  ;;  %v4654_v28 = vld [vmem:[#allocation5 + $0x924] sm:$0xf0] }
  0xf2   :  { %3116 = vmatpush.bf16.msrb.mxu0 %v4729_v42  ;;  %3082 = vmatmul.bf16.vlgmr.msra.gmra.mxu1 %v5602_v36  ;;  %v5410_v42 = vld [vmem:[#allocation5 + $0xba4] sm:$0xf]  ;;  %v2791_v0 = vpop.f32.mrf.mxu0  ;;  %v4777_v8 = vor.u32 %v5359_v59, %v4774_v3  ;;  %v4873_v9 = vor.u32 %v5383_v7, %v4870_v60  ;;  %v4738_v60 = vld [vmem:[#allocation5 + $0x9cc] sm:$0xf0] }
  0xf3   :  { %3130 = vmatpush.bf16.msrb.mxu1 %v4825_v48  ;;  %3096 = vmatmul.bf16.vlgmr.msra.gmra.mxu2 %v5600_v35  ;;  %v5663_v48 = vpop.f32.mrf.mxu2  ;;  %v4981_v50 = vor.u32 %v5410_v42, %v4978_v45  ;;  %v2750_v62 = vadd.f32 %v5643_v14, %v2736_v37  ;;  %v4858_v14 = vld [vmem:[#allocation5 + $0xabc] sm:$0xf0]  ;;  %v5377_v37 = vld [vmem:[#allocation5 + $0xa9c] sm:$0xf]  ;;  %v4846_v42 = vld [vmem:[#allocation5 + $0xaa4] sm:$0xf0] }
  0xf4   :  { %3144 = vmatpush.bf16.msrb.mxu2 %v4921_v49  ;;  %3110 = vmatmul.bf16.vlgmr.msra.gmra.mxu3 %v5604_v40  ;;  %v2776_v49 = vadd.f32 %v5638_v63, %v2762_v21  ;;  %v5669_v63 = vpop.f32.mrf.mxu1  ;;  %v4954_v21 = vld [vmem:[#allocation5 + $0xb7c] sm:$0xf0]  ;;  %v4861_v26 = vor.u32 %v5380_v25, %v4858_v14  ;;  %v5674_v45 = vpop.f32.mrf.mxu3  ;;  %v4849_v3 = vor.u32 %v5377_v37, %v4846_v42  ;;  %v5350_v7 = vld [vmem:[#allocation5 + $0x9c4] sm:$0xf]  ;;  %v3760_v42 = vld [vmem:[#allocation5 + $0x218] sm:$0xf] }
  0xf5   :  { %3158 = vmatpush.bf16.msrb.mxu3 %v5017_v55  ;;  %v5335_v55 = vld [vmem:[#allocation5 + $0x94c] sm:$0xf]  ;;  %v2764_v19 = vadd.f32 %v5648_v54, %v2750_v62  ;;  %v5374_v62 = vld [vmem:[#allocation5 + $0xa84] sm:$0xf]  ;;  %v4741_v25 = vor.u32 %v5350_v7, %v4738_v60  ;;  %v3652_v60 = vld [vmem:[#allocation5 + $0x140] sm:$0xf] }
  0xf6   :  { %3117 = vmatpush.bf16.msrb.mxu0 %v4717_v22  ;;  %v5407_v22 = vld [vmem:[#allocation5 + $0xb8c] sm:$0xf]  ;;  %v5082_v37 = vld [vmem:[#allocation5 + $0x160] sm:$0xf0] }
  0xf7   :  { %3131 = vmatpush.bf16.msrb.mxu1 %v4813_v5  ;;  %v4681_v5 = vor.u32 %v5335_v55, %v4678_v56  ;;  %v4969_v16 = vor.u32 %v5407_v22, %v4966_v2  ;;  %v2778_v54 = vadd.f32 %v5650_v61, %v2764_v19  ;;  %v5326_v55 = vld [vmem:[#allocation5 + $0x904] sm:$0xf]  ;;  %v4642_v56 = vld [vmem:[#allocation5 + $0x90c] sm:$0xf0]  ;;  %v5055_v7 = vld [vmem:[#allocation5 + $0x88] sm:$0xf0] }
  0xf8   :  { %3145 = vmatpush.bf16.msrb.mxu2 %v4909_v6  ;;  %v2790_v6 = vadd.f32 %v2789_v4, %v2776_v49  ;;  %v5401_v49 = vld [vmem:[#allocation5 + $0xb5c] sm:$0xf]  ;;  %v4834_v22 = vld [vmem:[#allocation5 + $0xa8c] sm:$0xf0]  ;;  %v5398_v2 = vld [vmem:[#allocation5 + $0xb44] sm:$0xf] }
  0xf9   :  { %3159 = vmatpush.bf16.msrb.mxu3 %v5005_v13  ;;  %v4666_v13 = vld [vmem:[#allocation5 + $0x93c] sm:$0xf0]  ;;  %v4837_v14 = vor.u32 %v5374_v62, %v4834_v22  ;;  %v3868_v19 = vld [vmem:[#allocation5 + $0x2f0] sm:$0xf]  ;;  %v5079_v62 = vld [vmem:[#allocation5 + $0x148] sm:$0xf0] }
  0xfa   :  { %3118 = vmatpush.bf16.msrb.mxu0 %v4705_v20  ;;  %v5404_v20 = vld [vmem:[#allocation5 + $0xb74] sm:$0xf]  ;;  %v2804_v4 = vadd.f32 %v5653_v12, %v2790_v6  ;;  %v4942_v12 = vld [vmem:[#allocation5 + $0xb64] sm:$0xf0]  ;;  %v2792_v6 = vadd.f32 %v2791_v0, %v2778_v54  ;;  %v5106_v54 = vld [vmem:[#allocation5 + $0x220] sm:$0xf0] }
  0xfb   :  { %3132 = vmatpush.bf16.msrb.mxu1 %v4801_v23  ;;  %v4669_v23 = vor.u32 %v5332_v11, %v4666_v13  ;;  %v2819_v30 = vpop.f32.mrf.mxu2  ;;  %v4957_v33 = vor.u32 %v5404_v20, %v4954_v21  ;;  %v4945_v61 = vor.u32 %v5401_v49, %v4942_v12  ;;  %v3676_v11 = vld [vmem:[#allocation5 + $0x170] sm:$0xf]  ;;  %v4645_v13 = vor.u32 %v5326_v55, %v4642_v56  ;;  %v5133_v20 = vld [vmem:[#allocation5 + $0x2f8] sm:$0xf0]  ;;  %v5130_v55 = vld [vmem:[#allocation5 + $0x2e0] sm:$0xf0] }
  0xfc   :  { %3146 = vmatpush.bf16.msrb.mxu2 %v4897_v24  ;;  %v4765_v24 = vor.u32 %v5356_v15, %v4762_v18  ;;  %v2818_v59 = vadd.f32 %v5663_v48, %v2804_v4  ;;  %v5085_v15 = vld [vmem:[#allocation5 + $0x178] sm:$0xf0]  ;;  %v3772_v48 = vld [vmem:[#allocation5 + $0x230] sm:$0xf]  ;;  %v2806_v4 = vadd.f32 %v5669_v63, %v2792_v6  ;;  %v5103_v22 = vld [vmem:[#allocation5 + $0x208] sm:$0xf0] }
  0xfd   :  { %3160 = vmatpush.bf16.msrb.mxu3 %v4993_v29  ;;  %v5353_v29 = vld [vmem:[#allocation5 + $0x9dc] sm:$0xf]  ;;  %v5127_v6 = vld [vmem:[#allocation5 + $0x2c8] sm:$0xf0] }
  0xfe   :  { %3119 = vmatpush.bf16.msrb.mxu0 %v4693_v57  ;;  %v2845_v57 = vpop.f32.mrf.mxu0  ;;  %v2832_v18 = vadd.f32 %v5666_v51, %v2818_v59  ;;  %v3869_v51 = vor.u32 %v5133_v20, %v3868_v19  ;;  %v2820_v49 = vadd.f32 %v2819_v30, %v2806_v4  ;;  %v5100_v19 = vld [vmem:[#allocation5 + $0x1f0] sm:$0xf0] }
  0xff   :  { %3133 = vmatpush.bf16.msrb.mxu1 %v4789_v52  ;;  %v2859_v52 = vpop.f32.mrf.mxu1  ;;  %v5124_v4 = vld [vmem:[#allocation5 + $0x2b0] sm:$0xf0] }
 0x100   :  { %3147 = vmatpush.bf16.msrb.mxu2 %v4885_v53  ;;  %v4657_v53 = vor.u32 %v5329_v27, %v4654_v28  ;;  %v3677_v27 = vor.u32 %v5085_v15, %v3676_v11 }
 0x101   :  { %3161 = vmatpush.bf16.msrb.mxu3 %v4981_v50  ;;  %v4753_v50 = vor.u32 %v5353_v29, %v4750_v34  ;;  %v3568_v29 = vld [vmem:[#allocation5 + $0x98] sm:$0xf] }
 0x102   :  { %3120 = vmatpush.bf16.msrb.mxu0 %v4681_v5  ;;  %v4930_v5 = vld [vmem:[#allocation5 + $0xb4c] sm:$0xf0]  ;;  %v3664_v34 = vld [vmem:[#allocation5 + $0x158] sm:$0xf] }
 0x103   :  { %3134 = vmatpush.bf16.msrb.mxu1 %v4777_v8  ;;  %v3580_v8 = vld [vmem:[#allocation5 + $0xb0] sm:$0xf]  ;;  %v2873_v21 = vpop.f32.mrf.mxu2  ;;  %v3665_v59 = vor.u32 %v5082_v37, %v3664_v34  ;;  %v5049_v37 = vld [vmem:[#allocation5 + $0x58] sm:$0xf0] }
 0x104   :  { %3148 = vmatpush.bf16.msrb.mxu2 %v4873_v9  ;;  %v5061_v9 = vld [vmem:[#allocation5 + $0xb8] sm:$0xf0] }
 0x105   :  { %3162 = vmatpush.bf16.msrb.mxu3 %v4969_v16  ;;  %v5109_v16 = vld [vmem:[#allocation5 + $0x238] sm:$0xf0]  ;;  %v3581_v0 = vor.u32 %v5061_v9, %v3580_v8  ;;  %v3544_v9 = vld [vmem:[#allocation5 + $0x68] sm:$0xf] }
 0x106   :  { %3121 = vmatpush.bf16.msrb.mxu0 %v4669_v23  ;;  %v4933_v23 = vor.u32 %v5398_v2, %v4930_v5  ;;  %v3773_v28 = vor.u32 %v5109_v16, %v3772_v48  ;;  %v2847_v12 = vpop.f32.mrf.mxu0  ;;  %v2834_v2 = vadd.f32 %v5674_v45, %v2820_v49  ;;  %v5052_v48 = vld [vmem:[#allocation5 + $0x70] sm:$0xf0]  ;;  %v3640_v16 = vld [vmem:[#allocation5 + $0x128] sm:$0xf]  ;;  %v5073_v49 = vld [vmem:[#allocation5 + $0x118] sm:$0xf0] }
 0x107   :  { %3135 = vmatpush.bf16.msrb.mxu1 %v4765_v24  ;;  %v2846_v24 = vadd.f32 %v2845_v57, %v2832_v18  ;;  %v2861_v56 = vpop.f32.mrf.mxu1  ;;  %v5076_v45 = vld [vmem:[#allocation5 + $0x130] sm:$0xf0] }
 0x108   :  { %3149 = vmatpush.bf16.msrb.mxu2 %v4861_v26  ;;  %v2887_v26 = vpop.f32.mrf.mxu3  ;;  %v2848_v11 = vadd.f32 %v2847_v12, %v2834_v2  ;;  %v5097_v12 = vld [vmem:[#allocation5 + $0x1d8] sm:$0xf0]  ;;  %v5094_v2 = vld [vmem:[#allocation5 + $0x1c0] sm:$0xf0] }
 0x109   :  { %3163 = vmatpush.bf16.msrb.mxu3 %v4957_v33  ;;  %v5058_v33 = vld [vmem:[#allocation5 + $0xa0] sm:$0xf0]  ;;  %v2860_v57 = vadd.f32 %v2859_v52, %v2846_v24  ;;  %v3844_v52 = vld [vmem:[#allocation5 + $0x2c0] sm:$0xf]  ;;  %v3545_v24 = vor.u32 %v5052_v48, %v3544_v9  ;;  %v3808_v9 = vld [vmem:[#allocation5 + $0x278] sm:$0xf] }
 0x10a   :  { %3122 = vmatpush.bf16.msrb.mxu0 %v4657_v53  ;;  %v3856_v53 = vld [vmem:[#allocation5 + $0x2d8] sm:$0xf]  ;;  %v3569_v63 = vor.u32 %v5058_v33, %v3568_v29  ;;  %v2862_v29 = vadd.f32 %v2861_v56, %v2848_v11  ;;  %v5118_v11 = vld [vmem:[#allocation5 + $0x280] sm:$0xf0] }
 0x10b   :  { %3136 = vmatpush.bf16.msrb.mxu1 %v4753_v50  ;;  %v3761_v50 = vor.u32 %v5106_v54, %v3760_v42  ;;  %v3857_v30 = vor.u32 %v5130_v55, %v3856_v53  ;;  %v2874_v5 = vadd.f32 %v2873_v21, %v2860_v57  ;;  %v2875_v18 = vpop.f32.mrf.mxu2  ;;  %v3628_v42 = vld [vmem:[#allocation5 + $0x110] sm:$0xf] }
 0x10c   :  { %3150 = vmatpush.bf16.msrb.mxu2 %v4849_v3  ;;  %v3556_v3 = vld [vmem:[#allocation5 + $0x80] sm:$0xf]  ;;  %v2876_v53 = vadd.f32 %v2875_v18, %v2862_v29  ;;  %v3820_v55 = vld [vmem:[#allocation5 + $0x290] sm:$0xf]  ;;  %v5040_v29 = vld [vmem:[#allocation5 + $0x10] sm:$0xf0] }
 0x10d   :  { %3164 = vmatpush.bf16.msrb.mxu3 %v4945_v61  ;;  %v3748_v61 = vld [vmem:[#allocation5 + $0x200] sm:$0xf]  ;;  %v3557_v8 = vor.u32 %v5055_v7, %v3556_v3  ;;  %v2888_v20 = vadd.f32 %v2887_v26, %v2874_v5  ;;  %v3724_v26 = vld [vmem:[#allocation5 + $0x1d0] sm:$0xf]  ;;  %v5046_v7 = vld [vmem:[#allocation5 + $0x40] sm:$0xf0] }
 0x10e   :  { %3123 = vmatpush.bf16.msrb.mxu0 %v4645_v13  ;;  %v3653_v13 = vor.u32 %v5079_v62, %v3652_v60  ;;  %v3749_v15 = vor.u32 %v5103_v22, %v3748_v61  ;;  %v3725_v3 = vor.u32 %v5097_v12, %v3724_v26  ;;  %v3616_v60 = vld [vmem:[#allocation5 + $0xf8] sm:$0xf]  ;;  %v3508_v18 = vld [vmem:[#allocation5 + $0x20] sm:$0xf]  ;;  %v5088_v12 = vld [vmem:[#allocation5 + $0x190] sm:$0xf0] }
 0x10f   :  { %3137 = vmatpush.bf16.msrb.mxu1 %v4741_v25  ;;  %v3845_v25 = vor.u32 %v5127_v6, %v3844_v52  ;;  %v3712_v22 = vld [vmem:[#allocation5 + $0x1b8] sm:$0xf] }
 0x110   :  { %3151 = vmatpush.bf16.msrb.mxu2 %v4837_v14  ;;  %v3736_v14 = vld [vmem:[#allocation5 + $0x1e8] sm:$0xf]  ;;  %v2889_v21 = vpop.f32.mrf.mxu3 }
 0x111   :  { %3165 = vmatpush.bf16.msrb.mxu3 %v4933_v23  ;;  %3124 = vmatmul.bf16.vlgmr.msrb.gmra.mxu0 %v5610_v32  ;;  %v2901_v23 = vpop.f32.mrf.mxu0  ;;  %v3737_v34 = vor.u32 %v5100_v19, %v3736_v14  ;;  %v2890_v5 = vadd.f32 %v2889_v21, %v2876_v53  ;;  %v3604_v14 = vld [vmem:[#allocation5 + $0xe0] sm:$0xf]  ;;  %v3809_v19 = vor.u32 %v5118_v11, %v3808_v9  ;;  %v5067_v21 = vld [vmem:[#allocation5 + $0xe8] sm:$0xf0]  ;;  %v3784_v53 = vld [vmem:[#allocation5 + $0x248] sm:$0xf] }
 0x112   :  { %3172 = vmatpush.bf16.msra.mxu0 %v3581_v0  ;;  %3138 = vmatmul.bf16.vlgmr.msrb.gmra.mxu1 %v5614_v41  ;;  %v3832_v0 = vld [vmem:[#allocation5 + $0x2a8] sm:$0xf]  ;;  %v2902_v33 = vadd.f32 %v2901_v23, %v2888_v20  ;;  %v3700_v23 = vld [vmem:[#allocation5 + $0x1a0] sm:$0xf] }
 0x113   :  { %3186 = vmatpush.bf16.msra.mxu1 %v3677_v27  ;;  %3152 = vmatmul.bf16.vlgmr.msrb.gmra.mxu2 %v5612_v38  ;;  %v3641_v27 = vor.u32 %v5076_v45, %v3640_v16  ;;  %v3833_v54 = vor.u32 %v5124_v4, %v3832_v0  ;;  %v3713_v45 = vor.u32 %v5094_v2, %v3712_v22  ;;  %v5091_v0 = vld [vmem:[#allocation5 + $0x1a8] sm:$0xf0]  ;;  %v3796_v4 = vld [vmem:[#allocation5 + $0x260] sm:$0xf]  ;;  %v4252_v2 = vld [vmem:[#allocation5 + $0x5f0] sm:$0xf] }
 0x114   :  { %3200 = vmatpush.bf16.msra.mxu2 %v3773_v28  ;;  %3166 = vmatmul.bf16.vlgmr.msrb.gmra.mxu3 %v5616_v46  ;;  %v2915_v28 = vpop.f32.mrf.mxu1 }
 0x115   :  { %3214 = vmatpush.bf16.msra.mxu3 %v3869_v51  ;;  %v3532_v51 = vld [vmem:[#allocation5 + $0x50] sm:$0xf]  ;;  %v2916_v56 = vadd.f32 %v2915_v28, %v2902_v33  ;;  %v3496_v28 = vld [vmem:[#allocation5 + $0x8] sm:$0xf] }
 0x116   :  { %3173 = vmatpush.bf16.msra.mxu0 %v3569_v63  ;;  %v5121_v63 = vld [vmem:[#allocation5 + $0x298] sm:$0xf0]  ;;  %v3533_v57 = vor.u32 %v5049_v37, %v3532_v51  ;;  %v2929_v61 = vpop.f32.mrf.mxu2  ;;  %v3701_v51 = vor.u32 %v5091_v0, %v3700_v23  ;;  %v3592_v37 = vld [vmem:[#allocation5 + $0xc8] sm:$0xf]  ;;  %v3940_v23 = vld [vmem:[#allocation5 + $0x380] sm:$0xf] }
 0x117   :  { %3187 = vmatpush.bf16.msra.mxu1 %v3665_v59  ;;  %v3520_v59 = vld [vmem:[#allocation5 + $0x38] sm:$0xf]  ;;  %v3821_v62 = vor.u32 %v5121_v63, %v3820_v55  ;;  %v2930_v52 = vadd.f32 %v2929_v61, %v2916_v56  ;;  %v5112_v55 = vld [vmem:[#allocation5 + $0x250] sm:$0xf0]  ;;  %v5157_v56 = vld [vmem:[#allocation5 + $0x3b8] sm:$0xf0] }
 0x118   :  { %3201 = vmatpush.bf16.msra.mxu2 %v3761_v50  ;;  %v3629_v50 = vor.u32 %v5073_v49, %v3628_v42  ;;  %v5064_v42 = vld [vmem:[#allocation5 + $0xd0] sm:$0xf0]  ;;  %v5151_v0 = vld [vmem:[#allocation5 + $0x388] sm:$0xf0] }
 0x119   :  { %3215 = vmatpush.bf16.msra.mxu3 %v3857_v30  ;;  %v5070_v30 = vld [vmem:[#allocation5 + $0x100] sm:$0xf0]  ;;  %v2903_v6 = vpop.f32.mrf.mxu0  ;;  %v3593_v61 = vor.u32 %v5064_v42, %v3592_v37 }
 0x11a   :  { %3174 = vmatpush.bf16.msra.mxu0 %v3557_v8  ;;  %v2943_v8 = vpop.f32.mrf.mxu3  ;;  %v2904_v48 = vadd.f32 %v2903_v6, %v2890_v5  ;;  %v5229_v5 = vld [vmem:[#allocation5 + $0x5f8] sm:$0xf0] }
 0x11b   :  { %3188 = vmatpush.bf16.msra.mxu1 %v3653_v13  ;;  %v3521_v13 = vor.u32 %v5046_v7, %v3520_v59  ;;  %v2944_v16 = vadd.f32 %v2943_v8, %v2930_v52  ;;  %v3964_v59 = vld [vmem:[#allocation5 + $0x3b0] sm:$0xf]  ;;  %v5181_v7 = vld [vmem:[#allocation5 + $0x478] sm:$0xf0]  ;;  %v3785_v52 = vor.u32 %v5112_v55, %v3784_v53  ;;  %v3952_v8 = vld [vmem:[#allocation5 + $0x398] sm:$0xf] }
 0x11c   :  { %3202 = vmatpush.bf16.msra.mxu2 %v3749_v15  ;;  %v3617_v15 = vor.u32 %v5070_v30, %v3616_v60  ;;  %v2917_v20 = vpop.f32.mrf.mxu1  ;;  %v4156_v60 = vld [vmem:[#allocation5 + $0x530] sm:$0xf]  ;;  %v5205_v30 = vld [vmem:[#allocation5 + $0x538] sm:$0xf0]  ;;  %v3965_v6 = vor.u32 %v5157_v56, %v3964_v59  ;;  %v4120_v53 = vld [vmem:[#allocation5 + $0x4e8] sm:$0xf] }
 0x11d   :  { %3216 = vmatpush.bf16.msra.mxu3 %v3845_v25  ;;  %v5043_v25 = vld [vmem:[#allocation5 + $0x28] sm:$0xf0]  ;;  %3396 = vst [vmem:[#allocation8] sm:$0xff] %v2944_v16  ;;  %v2918_v33 = vadd.f32 %v2917_v20, %v2904_v48  ;;  %v4157_v11 = vor.u32 %v5205_v30, %v4156_v60  ;;  %v4253_v48 = vor.u32 %v5229_v5, %v4252_v2  ;;  %v5178_v16 = vld [vmem:[#allocation5 + $0x460] sm:$0xf0] }
 0x11e   :  { %3175 = vmatpush.bf16.msra.mxu0 %v3545_v24  ;;  %v5115_v24 = vld [vmem:[#allocation5 + $0x268] sm:$0xf0]  ;;  %v2931_v26 = vpop.f32.mrf.mxu2  ;;  %v5196_v55 = vld [vmem:[#allocation5 + $0x4f0] sm:$0xf0]  ;;  %v3916_v59 = vld [vmem:[#allocation5 + $0x350] sm:$0xf] }
 0x11f   :  { %3189 = vmatpush.bf16.msra.mxu1 %v3641_v27  ;;  %v3509_v27 = vor.u32 %v5043_v25, %v3508_v18  ;;  %v3797_v49 = vor.u32 %v5115_v24, %v3796_v4  ;;  %v2932_v63 = vadd.f32 %v2931_v26, %v2918_v33  ;;  %v5202_v18 = vld [vmem:[#allocation5 + $0x520] sm:$0xf0]  ;;  %v4240_v25 = vld [vmem:[#allocation5 + $0x5d8] sm:$0xf]  ;;  %v4036_v4 = vld [vmem:[#allocation5 + $0x440] sm:$0xf] }
 0x120   :  { %3203 = vmatpush.bf16.msra.mxu2 %v3737_v34  ;;  %v3605_v34 = vor.u32 %v5067_v21, %v3604_v14  ;;  %v5226_v14 = vld [vmem:[#allocation5 + $0x5e0] sm:$0xf0]  ;;  %v4228_v33 = vld [vmem:[#allocation5 + $0x5c0] sm:$0xf]  ;;  %v4024_v26 = vld [vmem:[#allocation5 + $0x428] sm:$0xf] }
 0x121   :  { %3217 = vmatpush.bf16.msra.mxu3 %v3833_v54  ;;  %v3688_v54 = vld [vmem:[#allocation5 + $0x188] sm:$0xf]  ;;  %v4241_v24 = vor.u32 %v5226_v14, %v4240_v25  ;;  %v5145_v56 = vld [vmem:[#allocation5 + $0x358] sm:$0xf0]  ;;  %v4108_v60 = vld [vmem:[#allocation5 + $0x4d0] sm:$0xf] }
 0x122   :  { %3176 = vmatpush.bf16.msra.mxu0 %v3533_v57  ;;  %v2945_v57 = vpop.f32.mrf.mxu3  ;;  %v3689_v22 = vor.u32 %v5088_v12, %v3688_v54  ;;  %v3928_v54 = vld [vmem:[#allocation5 + $0x368] sm:$0xf]  ;;  %v5193_v30 = vld [vmem:[#allocation5 + $0x4d8] sm:$0xf0]  ;;  %v3892_v14 = vld [vmem:[#allocation5 + $0x320] sm:$0xf] }
 0x123   :  { %3190 = vmatpush.bf16.msra.mxu1 %v3629_v50  ;;  %v4060_v50 = vld [vmem:[#allocation5 + $0x470] sm:$0xf]  ;;  %v4109_v5 = vor.u32 %v5193_v30, %v4108_v60 }
 0x124   :  { %3204 = vmatpush.bf16.msra.mxu2 %v3725_v3  ;;  %v3497_v3 = vor.u32 %v5040_v29, %v3496_v28  ;;  %v4061_v9 = vor.u32 %v5181_v7, %v4060_v50  ;;  %v4132_v28 = vld [vmem:[#allocation5 + $0x500] sm:$0xf]  ;;  %v5199_v29 = vld [vmem:[#allocation5 + $0x508] sm:$0xf0]  ;;  %v4012_v50 = vld [vmem:[#allocation5 + $0x410] sm:$0xf] }
 0x125   :  { %3218 = vmatpush.bf16.msra.mxu3 %v3821_v62  ;;  %v2946_v62 = vadd.f32 %v2945_v57, %v2932_v63  ;;  %v4133_v42 = vor.u32 %v5199_v29, %v4132_v28  ;;  %v4216_v63 = vld [vmem:[#allocation5 + $0x5a8] sm:$0xf]  ;;  %v5169_v7 = vld [vmem:[#allocation5 + $0x418] sm:$0xf0] }
 0x126   :  { %3177 = vmatpush.bf16.msra.mxu0 %v3521_v13  ;;  %v5154_v13 = vld [vmem:[#allocation5 + $0x3a0] sm:$0xf0]  ;;  %v4013_v2 = vor.u32 %v5169_v7, %v4012_v50  ;;  %v3880_v29 = vld [vmem:[#allocation5 + $0x308] sm:$0xf]  ;;  %v4636_v50 = vld [vmem:[#allocation5 + $0x8f0] sm:$0xf] }
 0x127   :  { %3191 = vmatpush.bf16.msra.mxu1 %v3617_v15  ;;  %3399 = vst [vmem:[#allocation8 + $0x18] sm:$0xff] %v2946_v62  ;;  %v4048_v15 = vld [vmem:[#allocation5 + $0x458] sm:$0xf]  ;;  %v4204_v62 = vld [vmem:[#allocation5 + $0x590] sm:$0xf] }
 0x128   :  { %3205 = vmatpush.bf16.msra.mxu2 %v3713_v45  ;;  %v4144_v45 = vld [vmem:[#allocation5 + $0x518] sm:$0xf]  ;;  %v4049_v20 = vor.u32 %v5178_v16, %v4048_v15  ;;  %v5190_v15 = vld [vmem:[#allocation5 + $0x4c0] sm:$0xf0] }
 0x129   :  { %3219 = vmatpush.bf16.msra.mxu3 %v3809_v19  ;;  %v3953_v19 = vor.u32 %v5154_v13, %v3952_v8  ;;  %v4145_v21 = vor.u32 %v5202_v18, %v4144_v45  ;;  %v4000_v8 = vld [vmem:[#allocation5 + $0x3f8] sm:$0xf]  ;;  %v5214_v16 = vld [vmem:[#allocation5 + $0x580] sm:$0xf0] }
 0x12a   :  { %3178 = vmatpush.bf16.msra.mxu0 %v3509_v27  ;;  %v5175_v27 = vld [vmem:[#allocation5 + $0x448] sm:$0xf0]  ;;  %v4096_v13 = vld [vmem:[#allocation5 + $0x4b8] sm:$0xf] }
 0x12b   :  { %3192 = vmatpush.bf16.msra.mxu1 %v3605_v34  ;;  %v5223_v34 = vld [vmem:[#allocation5 + $0x5c8] sm:$0xf0]  ;;  %v4037_v37 = vor.u32 %v5175_v27, %v4036_v4  ;;  %v4097_v25 = vor.u32 %v5190_v15, %v4096_v13 }
 0x12c   :  { %3206 = vmatpush.bf16.msra.mxu2 %v3701_v51  ;;  %v3941_v51 = vor.u32 %v5151_v0, %v3940_v23  ;;  %v4229_v12 = vor.u32 %v5223_v34, %v4228_v33  ;;  %v5163_v23 = vld [vmem:[#allocation5 + $0x3e8] sm:$0xf0]  ;;  %v4084_v0 = vld [vmem:[#allocation5 + $0x4a0] sm:$0xf]  ;;  %v5136_v33 = vld [vmem:[#allocation5 + $0x310] sm:$0xf0] }
 0x12d   :  { %3220 = vmatpush.bf16.msra.mxu3 %v3797_v49  ;;  %v5148_v49 = vld [vmem:[#allocation5 + $0x370] sm:$0xf0]  ;;  %v5187_v4 = vld [vmem:[#allocation5 + $0x4a8] sm:$0xf0] }
 0x12e   :  { %3179 = vmatpush.bf16.msra.mxu0 %v3497_v3  ;;  %v5211_v27 = vld [vmem:[#allocation5 + $0x568] sm:$0xf0] }
 0x12f   :  { %3193 = vmatpush.bf16.msra.mxu1 %v3593_v61  ;;  %v5217_v61 = vld [vmem:[#allocation5 + $0x598] sm:$0xf0] }
 0x130   :  { %3207 = vmatpush.bf16.msra.mxu2 %v3689_v22  ;;  %v3917_v22 = vor.u32 %v5145_v56, %v3916_v59 }
 0x131   :  { %3221 = vmatpush.bf16.msra.mxu3 %v3785_v52  ;;  %3180 = vmatmul.bf16.vlgmr.msra.gmra.mxu0 %v5574_v58  ;;  %v5172_v58 = vld [vmem:[#allocation5 + $0x430] sm:$0xf0]  ;;  %v3904_v52 = vld [vmem:[#allocation5 + $0x338] sm:$0xf] }
 0x132   :  { %3228 = vmatpush.bf16.msrb.mxu0 %v3965_v6  ;;  %3194 = vmatmul.bf16.vlgmr.msra.gmra.mxu1 %v5580_v10  ;;  %v3929_v10 = vor.u32 %v5148_v49, %v3928_v54  ;;  %v4025_v57 = vor.u32 %v5172_v58, %v4024_v26  ;;  %v5142_v6 = vld [vmem:[#allocation5 + $0x340] sm:$0xf0]  ;;  %v4072_v54 = vld [vmem:[#allocation5 + $0x488] sm:$0xf]  ;;  %v5184_v26 = vld [vmem:[#allocation5 + $0x490] sm:$0xf0] }
 0x133   :  { %3242 = vmatpush.bf16.msrb.mxu1 %v4061_v9  ;;  %3208 = vmatmul.bf16.vlgmr.msra.gmra.mxu2 %v5576_v1  ;;  %v5220_v1 = vld [vmem:[#allocation5 + $0x5b0] sm:$0xf0]  ;;  %v4205_v9 = vor.u32 %v5217_v61, %v4204_v62  ;;  %v3905_v45 = vor.u32 %v5142_v6, %v3904_v52  ;;  %v4073_v56 = vor.u32 %v5184_v26, %v4072_v54  ;;  %v4336_v61 = vld [vmem:[#allocation5 + $0x698] sm:$0xf]  ;;  %v5274_v52 = vld [vmem:[#allocation5 + $0x760] sm:$0xf0] }
 0x134   :  { %3256 = vmatpush.bf16.msrb.mxu2 %v4157_v11  ;;  %3222 = vmatmul.bf16.vlgmr.msra.gmra.mxu3 %v5582_v17  ;;  %v4121_v17 = vor.u32 %v5196_v55, %v4120_v53  ;;  %v4217_v3 = vor.u32 %v5220_v1, %v4216_v63  ;;  %v5166_v11 = vld [vmem:[#allocation5 + $0x400] sm:$0xf0]  ;;  %v5208_v58 = vld [vmem:[#allocation5 + $0x550] sm:$0xf0]  ;;  %v4348_v53 = vld [vmem:[#allocation5 + $0x6b0] sm:$0xf]  ;;  %v3881_v1 = vor.u32 %v5136_v33, %v3880_v29 }
 0x135   :  { %3270 = vmatpush.bf16.msrb.mxu3 %v4253_v48  ;;  %v4192_v48 = vld [vmem:[#allocation5 + $0x578] sm:$0xf]  ;;  %v4001_v18 = vor.u32 %v5166_v11, %v4000_v8  ;;  %v5253_v55 = vld [vmem:[#allocation5 + $0x6b8] sm:$0xf0]  ;;  %v4444_v63 = vld [vmem:[#allocation5 + $0x770] sm:$0xf] }
 0x136   :  { %3229 = vmatpush.bf16.msrb.mxu0 %v3953_v19  ;;  %v5139_v19 = vld [vmem:[#allocation5 + $0x328] sm:$0xf0]  ;;  %v4349_v60 = vor.u32 %v5253_v55, %v4348_v53  ;;  %v4528_v6 = vld [vmem:[#allocation5 + $0x818] sm:$0xf]  ;;  %v5298_v8 = vld [vmem:[#allocation5 + $0x820] sm:$0xf0] }
 0x137   :  { %3243 = vmatpush.bf16.msrb.mxu1 %v4049_v20  ;;  %v3988_v20 = vld [vmem:[#allocation5 + $0x3e0] sm:$0xf]  ;;  %v3893_v28 = vor.u32 %v5139_v19, %v3892_v14  ;;  %v5322_v11 = vld [vmem:[#allocation5 + $0x8e0] sm:$0xf0]  ;;  %v5271_v14 = vld [vmem:[#allocation5 + $0x748] sm:$0xf0] }
 0x138   :  { %3257 = vmatpush.bf16.msrb.mxu2 %v4145_v21  ;;  %v4193_v21 = vor.u32 %v5214_v16, %v4192_v48  ;;  %v3989_v34 = vor.u32 %v5163_v23, %v3988_v20  ;;  %v4529_v48 = vor.u32 %v5298_v8, %v4528_v6  ;;  %v4324_v16 = vld [vmem:[#allocation5 + $0x680] sm:$0xf]  ;;  %v5295_v20 = vld [vmem:[#allocation5 + $0x808] sm:$0xf0]  ;;  %v5268_v33 = vld [vmem:[#allocation5 + $0x730] sm:$0xf0] }
 0x139   :  { %3271 = vmatpush.bf16.msrb.mxu3 %v4241_v24  ;;  %v4180_v24 = vld [vmem:[#allocation5 + $0x560] sm:$0xf]  ;;  %v5319_v23 = vld [vmem:[#allocation5 + $0x8c8] sm:$0xf0]  ;;  %v4300_v54 = vld [vmem:[#allocation5 + $0x650] sm:$0xf] }
 0x13a   :  { %3230 = vmatpush.bf16.msrb.mxu0 %v3941_v51  ;;  %v4085_v51 = vor.u32 %v5187_v4, %v4084_v0  ;;  %v4181_v49 = vor.u32 %v5211_v27, %v4180_v24  ;;  %v4516_v19 = vld [vmem:[#allocation5 + $0x800] sm:$0xf]  ;;  %v4312_v27 = vld [vmem:[#allocation5 + $0x668] sm:$0xf]  ;;  %v4396_v26 = vld [vmem:[#allocation5 + $0x710] sm:$0xf] }
 0x13b   :  { %3244 = vmatpush.bf16.msrb.mxu1 %v4037_v37  ;;  %v3976_v37 = vld [vmem:[#allocation5 + $0x3c8] sm:$0xf]  ;;  %v4517_v24 = vor.u32 %v5295_v20, %v4516_v19  ;;  %v4492_v53 = vld [vmem:[#allocation5 + $0x7d0] sm:$0xf]  ;;  %v5289_v55 = vld [vmem:[#allocation5 + $0x7d8] sm:$0xf0] }
 0x13c   :  { %3258 = vmatpush.bf16.msrb.mxu2 %v4133_v42  ;;  %v5160_v42 = vld [vmem:[#allocation5 + $0x3d0] sm:$0xf0]  ;;  %v4276_v8 = vld [vmem:[#allocation5 + $0x620] sm:$0xf] }
 0x13d   :  { %3272 = vmatpush.bf16.msrb.mxu3 %v4229_v12  ;;  %v4168_v12 = vld [vmem:[#allocation5 + $0x548] sm:$0xf]  ;;  %v3977_v59 = vor.u32 %v5160_v42, %v3976_v37  ;;  %v5700_v19 = vld [vmem:[#allocation7] sm:$0x7] }
 0x13e   :  { %3231 = vmatpush.bf16.msrb.mxu0 %v3929_v10  ;;  %v5277_v10 = vld [vmem:[#allocation5 + $0x778] sm:$0xf0]  ;;  %v4169_v7 = vor.u32 %v5208_v58, %v4168_v12  ;;  %v591_v20 = vperm.slane %v5700_v19, 1 }
 0x13f   :  { %3245 = vmatpush.bf16.msrb.mxu1 %v4025_v57  ;;  %v4540_v57 = vld [vmem:[#allocation5 + $0x830] sm:$0xf]  ;;  %v4445_v30 = vor.u32 %v5277_v10, %v4444_v63  ;;  %v5265_v58 = vld [vmem:[#allocation5 + $0x718] sm:$0xf0]  ;;  %v5692_v63 = vpop.f32.mrf.mxu0 }
 0x140   :  { %3259 = vmatpush.bf16.msrb.mxu2 %v4121_v17  ;;  %v5301_v17 = vld [vmem:[#allocation5 + $0x838] sm:$0xf0] }
 0x141   :  { %3273 = vmatpush.bf16.msrb.mxu3 %v4217_v3  ;;  %v5325_v3 = vld [vmem:[#allocation5 + $0x8f8] sm:$0xf0]  ;;  %v4541_v62 = vor.u32 %v5301_v17, %v4540_v57  ;;  %v5694_v57 = vpop.f32.mrf.mxu1 }
 0x142   :  { %3232 = vmatpush.bf16.msrb.mxu0 %v3917_v22  ;;  %v5250_v22 = vld [vmem:[#allocation5 + $0x6a0] sm:$0xf0]  ;;  %v5313_v10 = vld [vmem:[#allocation5 + $0x898] sm:$0xf0] }
 0x143   :  { %3246 = vmatpush.bf16.msrb.mxu1 %v4013_v2  ;;  %v4432_v2 = vld [vmem:[#allocation5 + $0x758] sm:$0xf]  ;;  %v4337_v13 = vor.u32 %v5250_v22, %v4336_v61  ;;  %v5286_v61 = vld [vmem:[#allocation5 + $0x7c0] sm:$0xf0] }
 0x144   :  { %3260 = vmatpush.bf16.msrb.mxu2 %v4109_v5  ;;  %v4637_v5 = vor.u32 %v5325_v3, %v4636_v50  ;;  %v4433_v15 = vor.u32 %v5274_v52, %v4432_v2  ;;  %v4288_v50 = vld [vmem:[#allocation5 + $0x638] sm:$0xf]  ;;  %v5238_v3 = vld [vmem:[#allocation5 + $0x640] sm:$0xf0] }
 0x145   :  { %3274 = vmatpush.bf16.msrb.mxu3 %v4205_v9  ;;  %v4624_v9 = vld [vmem:[#allocation5 + $0x8d8] sm:$0xf]  ;;  %v5310_v2 = vld [vmem:[#allocation5 + $0x880] sm:$0xf0] }
 0x146   :  { %3233 = vmatpush.bf16.msrb.mxu0 %v3905_v45  ;;  %v5247_v45 = vld [vmem:[#allocation5 + $0x688] sm:$0xf0]  ;;  %v4576_v22 = vld [vmem:[#allocation5 + $0x878] sm:$0xf] }
 0x147   :  { %3247 = vmatpush.bf16.msrb.mxu1 %v4001_v18  ;;  %v4420_v18 = vld [vmem:[#allocation5 + $0x740] sm:$0xf]  ;;  %v4325_v0 = vor.u32 %v5247_v45, %v4324_v16  ;;  %v5283_v45 = vld [vmem:[#allocation5 + $0x7a8] sm:$0xf0] }
 0x148   :  { %3261 = vmatpush.bf16.msrb.mxu2 %v4097_v25  ;;  %v4625_v25 = vor.u32 %v5322_v11, %v4624_v9  ;;  %v4421_v4 = vor.u32 %v5271_v14, %v4420_v18  ;;  %v5235_v9 = vld [vmem:[#allocation5 + $0x628] sm:$0xf0]  ;;  %v4372_v11 = vld [vmem:[#allocation5 + $0x6e0] sm:$0xf]  ;;  %v5698_v18 = vpop.f32.mrf.mxu3 }
 0x149   :  { %3275 = vmatpush.bf16.msrb.mxu3 %v4193_v21  ;;  %v4612_v21 = vld [vmem:[#allocation5 + $0x8c0] sm:$0xf]  ;;  %v5307_v14 = vld [vmem:[#allocation5 + $0x868] sm:$0xf0] }
 0x14a   :  { %3234 = vmatpush.bf16.msrb.mxu0 %v3893_v28  ;;  %v4408_v28 = vld [vmem:[#allocation5 + $0x728] sm:$0xf]  ;;  %v4613_v29 = vor.u32 %v5319_v23, %v4612_v21  ;;  %v4468_v16 = vld [vmem:[#allocation5 + $0x7a0] sm:$0xf]  ;;  %v4277_v21 = vor.u32 %v5235_v9, %v4276_v8 }
 0x14b   :  { %3248 = vmatpush.bf16.msrb.mxu1 %v3989_v34  ;;  %v4504_v34 = vld [vmem:[#allocation5 + $0x7e8] sm:$0xf] }
 0x14c   :  { %3262 = vmatpush.bf16.msrb.mxu2 %v4085_v51  ;;  %v4600_v51 = vld [vmem:[#allocation5 + $0x8a8] sm:$0xf] }
 0x14d   :  { %3276 = vmatpush.bf16.msrb.mxu3 %v4181_v49  ;;  %v5241_v49 = vld [vmem:[#allocation5 + $0x658] sm:$0xf0]  ;;  %v4264_v23 = vld [vmem:[#allocation5 + $0x608] sm:$0xf] }
 0x14e   :  { %3235 = vmatpush.bf16.msrb.mxu0 %v3881_v1  ;;  %v4588_v1 = vld [vmem:[#allocation5 + $0x890] sm:$0xf]  ;;  %v4301_v17 = vor.u32 %v5241_v49, %v4300_v54  ;;  %v5373_v49 = vld [vmem:[#allocation5 + $0xa78] sm:$0xf0] }
 0x14f   :  { %3249 = vmatpush.bf16.msrb.mxu1 %v3977_v59  ;;  %v4397_v59 = vor.u32 %v5265_v58, %v4396_v26  ;;  %v4924_v26 = vld [vmem:[#allocation5 + $0xb30] sm:$0xf] }
 0x150   :  { %3263 = vmatpush.bf16.msrb.mxu2 %v4073_v56  ;;  %v4493_v56 = vor.u32 %v5289_v55, %v4492_v53  ;;  %v5020_v55 = vld [vmem:[#allocation5 + $0xbf0] sm:$0xf] }
 0x151   :  { %3277 = vmatpush.bf16.msrb.mxu3 %v4169_v7  ;;  %3236 = vmatmul.bf16.vlgmr.msrb.gmra.mxu0 %v5586_v39  ;;  %v5244_v39 = vld [vmem:[#allocation5 + $0x670] sm:$0xf0]  ;;  %v4384_v7 = vld [vmem:[#allocation5 + $0x6f8] sm:$0xf] }
 0x152   :  { %3284 = vmatpush.bf16.msra.mxu0 %v4349_v60  ;;  %3250 = vmatmul.bf16.vlgmr.msrb.gmra.mxu1 %v5590_v44  ;;  %v5316_v44 = vld [vmem:[#allocation5 + $0x8b0] sm:$0xf0]  ;;  %v4313_v37 = vor.u32 %v5244_v39, %v4312_v27  ;;  %v4589_v60 = vor.u32 %v5313_v10, %v4588_v1  ;;  %v4469_v27 = vor.u32 %v5283_v45, %v4468_v16  ;;  %v4360_v39 = vld [vmem:[#allocation5 + $0x6c8] sm:$0xf]  ;;  %v5421_v1 = vld [vmem:[#allocation5 + $0xbf8] sm:$0xf0] }
 0x153   :  { %3298 = vmatpush.bf16.msra.mxu1 %v4445_v30  ;;  %3264 = vmatmul.bf16.vlgmr.msrb.gmra.mxu2 %v5588_v43  ;;  %v5292_v43 = vld [vmem:[#allocation5 + $0x7f0] sm:$0xf0]  ;;  %v4601_v12 = vor.u32 %v5316_v44, %v4600_v51  ;;  %v5262_v30 = vld [vmem:[#allocation5 + $0x700] sm:$0xf0]  ;;  %v4552_v51 = vld [vmem:[#allocation5 + $0x848] sm:$0xf] }
 0x154   :  { %3312 = vmatpush.bf16.msra.mxu2 %v4541_v62  ;;  %3278 = vmatmul.bf16.vlgmr.msrb.gmra.mxu3 %v5592_v47  ;;  %v4409_v47 = vor.u32 %v5268_v33, %v4408_v28  ;;  %v4505_v42 = vor.u32 %v5292_v43, %v4504_v34  ;;  %v4480_v62 = vld [vmem:[#allocation5 + $0x7b8] sm:$0xf]  ;;  %v4385_v52 = vor.u32 %v5262_v30, %v4384_v7  ;;  %v5256_v28 = vld [vmem:[#allocation5 + $0x6d0] sm:$0xf0]  ;;  %v5705_v33 = vpop.f32.mrf.mxu1  ;;  %v5346_v7 = vld [vmem:[#allocation5 + $0x9a0] sm:$0xf0] }
 0x155   :  { %3326 = vmatpush.bf16.msra.mxu3 %v4637_v5  ;;  %v4289_v5 = vor.u32 %v5238_v3, %v4288_v50  ;;  %v4481_v6 = vor.u32 %v5286_v61, %v4480_v62  ;;  %v5280_v43 = vld [vmem:[#allocation5 + $0x790] sm:$0xf0]  ;;  %v4361_v58 = vor.u32 %v5256_v28, %v4360_v39  ;;  %v4720_v3 = vld [vmem:[#allocation5 + $0x998] sm:$0xf]  ;;  %v5021_v62 = vor.u32 %v5421_v1, %v5020_v55  ;;  %v5370_v61 = vld [vmem:[#allocation5 + $0xa60] sm:$0xf0] }
 0x156   :  { %3285 = vmatpush.bf16.msra.mxu0 %v4337_v13  ;;  %v5696_v13 = vpop.f32.mrf.mxu2  ;;  %v5304_v44 = vld [vmem:[#allocation5 + $0x850] sm:$0xf0]  ;;  %v5343_v16 = vld [vmem:[#allocation5 + $0x988] sm:$0xf0]  ;;  %v4804_v45 = vld [vmem:[#allocation5 + $0xa40] sm:$0xf] }
 0x157   :  { %3299 = vmatpush.bf16.msra.mxu1 %v4433_v15  ;;  %v4577_v15 = vor.u32 %v5310_v2, %v4576_v22  ;;  %v4553_v10 = vor.u32 %v5304_v44, %v4552_v51  ;;  %v4912_v22 = vld [vmem:[#allocation5 + $0xb18] sm:$0xf]  ;;  %v5394_v2 = vld [vmem:[#allocation5 + $0xb20] sm:$0xf0]  ;;  %v4888_v44 = vld [vmem:[#allocation5 + $0xae8] sm:$0xf] }
 0x158   :  { %3313 = vmatpush.bf16.msra.mxu2 %v4529_v48  ;;  %v5259_v48 = vld [vmem:[#allocation5 + $0x6e8] sm:$0xf0]  ;;  %v4780_v55 = vld [vmem:[#allocation5 + $0xa10] sm:$0xf] }
 0x159   :  { %3327 = vmatpush.bf16.msra.mxu3 %v4625_v25  ;;  %v4564_v25 = vld [vmem:[#allocation5 + $0x860] sm:$0xf] }
 0x15a   :  { %3286 = vmatpush.bf16.msra.mxu0 %v4325_v0  ;;  %v5232_v0 = vld [vmem:[#allocation5 + $0x610] sm:$0xf0]  ;;  %v4565_v34 = vor.u32 %v5307_v14, %v4564_v25 }
 0x15b   :  { %3300 = vmatpush.bf16.msra.mxu1 %v4421_v4  ;;  %v5703_v4 = vpop.f32.mrf.mxu0  ;;  %v4265_v54 = vor.u32 %v5232_v0, %v4264_v23  ;;  %v4900_v23 = vld [vmem:[#allocation5 + $0xb00] sm:$0xf]  ;;  %v5391_v0 = vld [vmem:[#allocation5 + $0xb08] sm:$0xf0] }
 0x15c   :  { %3314 = vmatpush.bf16.msra.mxu2 %v4517_v24  ;;  %v4373_v24 = vor.u32 %v5259_v48, %v4372_v11  ;;  %v4708_v48 = vld [vmem:[#allocation5 + $0x980] sm:$0xf]  ;;  %v5715_v25 = vpop.f32.mrf.mxu1 }
 0x15d   :  { %3328 = vmatpush.bf16.msra.mxu3 %v4613_v29  ;;  %v4456_v29 = vld [vmem:[#allocation5 + $0x788] sm:$0xf] }
 0x15e   :  { %3287 = vmatpush.bf16.msra.mxu0 %v4313_v37  ;;  %v4732_v37 = vld [vmem:[#allocation5 + $0x9b0] sm:$0xf]  ;;  %v4457_v53 = vor.u32 %v5280_v43, %v4456_v29  ;;  %v5710_v30 = vpop.f32.mrf.mxu2  ;;  %v4696_v29 = vld [vmem:[#allocation5 + $0x968] sm:$0xf] }
 0x15f   :  { %3301 = vmatpush.bf16.msra.mxu1 %v4409_v47  ;;  %v5349_v47 = vld [vmem:[#allocation5 + $0x9b8] sm:$0xf0]  ;;  %v4792_v43 = vld [vmem:[#allocation5 + $0xa28] sm:$0xf] }
 0x160   :  { %3315 = vmatpush.bf16.msra.mxu2 %v4505_v42  ;;  %v4828_v42 = vld [vmem:[#allocation5 + $0xa70] sm:$0xf] }
 0x161   :  { %3329 = vmatpush.bf16.msra.mxu3 %v4601_v12  ;;  %v5397_v12 = vld [vmem:[#allocation5 + $0xb38] sm:$0xf0] }
 0x162   :  { %3288 = vmatpush.bf16.msra.mxu0 %v4301_v17  ;;  %v4733_v17 = vor.u32 %v5349_v47, %v4732_v37  ;;  %v4925_v50 = vor.u32 %v5397_v12, %v4924_v26  ;;  %v4984_v37 = vld [vmem:[#allocation5 + $0xba8] sm:$0xf]  ;;  %v5412_v47 = vld [vmem:[#allocation5 + $0xbb0] sm:$0xf0] }
 0x163   :  { %3302 = vmatpush.bf16.msra.mxu1 %v4397_v59  ;;  %v2958_v59 = vadd.f32 %v5692_v63, %v591_v20  ;;  %v4721_v63 = vor.u32 %v5346_v7, %v4720_v3  ;;  %v3013_v9 = vpop.f32.mrf.mxu0  ;;  %v4985_v1 = vor.u32 %v5412_v47, %v4984_v37  ;;  %v4744_v37 = vld [vmem:[#allocation5 + $0x9c8] sm:$0xf] }
 0x164   :  { %3316 = vmatpush.bf16.msra.mxu2 %v4493_v56  ;;  %v4829_v56 = vor.u32 %v5373_v49, %v4828_v42 }
 0x165   :  { %3330 = vmatpush.bf16.msra.mxu3 %v4589_v60  ;;  %v4816_v60 = vld [vmem:[#allocation5 + $0xa58] sm:$0xf]  ;;  %v2972_v8 = vadd.f32 %v5694_v57, %v2958_v59  ;;  %v4996_v57 = vld [vmem:[#allocation5 + $0xbc0] sm:$0xf] }
 0x166   :  { %3289 = vmatpush.bf16.msra.mxu0 %v4289_v5  ;;  %v5712_v5 = vpop.f32.mrf.mxu3  ;;  %v4817_v11 = vor.u32 %v5370_v61, %v4816_v60  ;;  %v5725_v42 = vpop.f32.mrf.mxu2  ;;  %v4672_v61 = vld [vmem:[#allocation5 + $0x938] sm:$0xf] }
 0x167   :  { %3303 = vmatpush.bf16.msra.mxu1 %v4385_v52  ;;  %v5008_v52 = vld [vmem:[#allocation5 + $0xbd8] sm:$0xf]  ;;  %v2986_v39 = vadd.f32 %v5696_v13, %v2972_v8 }
 0x168   :  { %3317 = vmatpush.bf16.msra.mxu2 %v4481_v6  ;;  %v5418_v6 = vld [vmem:[#allocation5 + $0xbe0] sm:$0xf0] }
 0x169   :  { %3331 = vmatpush.bf16.msra.mxu3 %v4577_v15  ;;  %v4913_v15 = vor.u32 %v5394_v2, %v4912_v22  ;;  %v5009_v14 = vor.u32 %v5418_v6, %v5008_v52  ;;  %v5334_v22 = vld [vmem:[#allocation5 + $0x940] sm:$0xf0]  ;;  %v4768_v2 = vld [vmem:[#allocation5 + $0x9f8] sm:$0xf] }
 0x16a   :  { %3290 = vmatpush.bf16.msra.mxu0 %v4277_v21  ;;  %v5367_v21 = vld [vmem:[#allocation5 + $0xa48] sm:$0xf0]  ;;  %v5358_v6 = vld [vmem:[#allocation5 + $0xa00] sm:$0xf0] }
 0x16b   :  { %3304 = vmatpush.bf16.msra.mxu1 %v4373_v24  ;;  %v5415_v24 = vld [vmem:[#allocation5 + $0xbc8] sm:$0xf0]  ;;  %v4805_v28 = vor.u32 %v5367_v21, %v4804_v45  ;;  %v3015_v59 = vpop.f32.mrf.mxu0 }
 0x16c   :  { %3318 = vmatpush.bf16.msra.mxu2 %v4469_v27  ;;  %v4709_v27 = vor.u32 %v5343_v16, %v4708_v48  ;;  %v4997_v51 = vor.u32 %v5415_v24, %v4996_v57  ;;  %v4673_v48 = vor.u32 %v5334_v22, %v4672_v61  ;;  %v4769_v16 = vor.u32 %v5358_v6, %v4768_v2  ;;  %v5331_v21 = vld [vmem:[#allocation5 + $0x928] sm:$0xf0] }
 0x16d   :  { %3332 = vmatpush.bf16.msra.mxu3 %v4565_v34  ;;  %v5340_v34 = vld [vmem:[#allocation5 + $0x970] sm:$0xf0]  ;;  %v5355_v24 = vld [vmem:[#allocation5 + $0x9e8] sm:$0xf0] }
 0x16e   :  { %3291 = vmatpush.bf16.msra.mxu0 %v4265_v54  ;;  %v4697_v13 = vor.u32 %v5340_v34, %v4696_v29  ;;  %v3000_v54 = vadd.f32 %v5698_v18, %v2986_v39  ;;  %v5728_v49 = vpop.f32.mrf.mxu3  ;;  %v5731_v18 = vpop.f32.mrf.mxu1  ;;  %v5379_v39 = vld [vmem:[#allocation5 + $0xaa8] sm:$0xf0]  ;;  %v4948_v29 = vld [vmem:[#allocation5 + $0xb60] sm:$0xf] }
 0x16f   :  { %3305 = vmatpush.bf16.msra.mxu1 %v4361_v58  ;;  %v4684_v58 = vld [vmem:[#allocation5 + $0x950] sm:$0xf]  ;;  %v5403_v34 = vld [vmem:[#allocation5 + $0xb68] sm:$0xf0] }
 0x170   :  { %3319 = vmatpush.bf16.msra.mxu2 %v4457_v53  ;;  %v5337_v53 = vld [vmem:[#allocation5 + $0x958] sm:$0xf0]  ;;  %v3014_v7 = vadd.f32 %v3013_v9, %v3000_v54  ;;  %v4949_v47 = vor.u32 %v5403_v34, %v4948_v29  ;;  %v5376_v54 = vld [vmem:[#allocation5 + $0xa90] sm:$0xf0] }
 0x171   :  { %3333 = vmatpush.bf16.msra.mxu3 %v4553_v10  ;;  %3292 = vmatmul.bf16.vlgmr.msra.gmra.mxu0 %v5598_v31  ;;  %v4901_v31 = vor.u32 %v5391_v0, %v4900_v23  ;;  %v5385_v10 = vld [vmem:[#allocation5 + $0xad8] sm:$0xf0]  ;;  %v4685_v3 = vor.u32 %v5337_v53, %v4684_v58  ;;  %v4756_v23 = vld [vmem:[#allocation5 + $0x9e0] sm:$0xf]  ;;  %v3043_v0 = vpop.f32.mrf.mxu2  ;;  %v5400_v58 = vld [vmem:[#allocation5 + $0xb50] sm:$0xf0] }
 0x172   :  { %3340 = vmatpush.bf16.msrb.mxu0 %v4733_v17  ;;  %3306 = vmatmul.bf16.vlgmr.msra.gmra.mxu1 %v5602_v36  ;;  %v5388_v36 = vld [vmem:[#allocation5 + $0xaf0] sm:$0xf0]  ;;  %v3028_v9 = vadd.f32 %v5715_v25, %v3014_v7 }
 0x173   :  { %3354 = vmatpush.bf16.msrb.mxu1 %v4829_v56  ;;  %3320 = vmatmul.bf16.vlgmr.msra.gmra.mxu2 %v5600_v35  ;;  %v5364_v35 = vld [vmem:[#allocation5 + $0xa30] sm:$0xf0]  ;;  %v4889_v12 = vor.u32 %v5388_v36, %v4888_v44  ;;  %v4972_v56 = vld [vmem:[#allocation5 + $0xb90] sm:$0xf]  ;;  %v4648_v36 = vld [vmem:[#allocation5 + $0x908] sm:$0xf] }
 0x174   :  { %3368 = vmatpush.bf16.msrb.mxu2 %v4925_v50  ;;  %3334 = vmatmul.bf16.vlgmr.msra.gmra.mxu3 %v5604_v40  ;;  %v2960_v40 = vadd.f32 %v5703_v4, %v591_v20  ;;  %v4793_v26 = vor.u32 %v5364_v35, %v4792_v43  ;;  %v5361_v20 = vld [vmem:[#allocation5 + $0xa18] sm:$0xf0]  ;;  %v4876_v4 = vld [vmem:[#allocation5 + $0xad0] sm:$0xf]  ;;  %v4757_v35 = vor.u32 %v5355_v24, %v4756_v23 }
 0x175   :  { %3382 = vmatpush.bf16.msrb.mxu3 %v5021_v62  ;;  %v5409_v50 = vld [vmem:[#allocation5 + $0xb98] sm:$0xf0]  ;;  %v4781_v60 = vor.u32 %v5361_v20, %v4780_v55  ;;  %v4877_v62 = vor.u32 %v5385_v10, %v4876_v4 }
 0x176   :  { %3341 = vmatpush.bf16.msrb.mxu0 %v4721_v63  ;;  %v2974_v17 = vadd.f32 %v5705_v33, %v2960_v40  ;;  %v4973_v52 = vor.u32 %v5409_v50, %v4972_v56  ;;  %v4864_v63 = vld [vmem:[#allocation5 + $0xab8] sm:$0xf]  ;;  %v5382_v33 = vld [vmem:[#allocation5 + $0xac0] sm:$0xf0]  ;;  %v3083_v25 = vpop.f32.mrf.mxu1  ;;  %v5328_v40 = vld [vmem:[#allocation5 + $0x910] sm:$0xf0] }
 0x177   :  { %3355 = vmatpush.bf16.msrb.mxu1 %v4817_v11  ;;  %v4960_v11 = vld [vmem:[#allocation5 + $0xb78] sm:$0xf]  ;;  %v4865_v45 = vor.u32 %v5382_v33, %v4864_v63  ;;  %v4649_v53 = vor.u32 %v5328_v40, %v4648_v36 }
 0x178   :  { %3369 = vmatpush.bf16.msrb.mxu2 %v4913_v15  ;;  %v2988_v8 = vadd.f32 %v5710_v30, %v2974_v17  ;;  %v5406_v15 = vld [vmem:[#allocation5 + $0xb80] sm:$0xf0] }
 0x179   :  { %3383 = vmatpush.bf16.msrb.mxu3 %v5009_v14  ;;  %v4660_v14 = vld [vmem:[#allocation5 + $0x920] sm:$0xf]  ;;  %v4961_v57 = vor.u32 %v5406_v15, %v4960_v11  ;;  %v3097_v20 = vpop.f32.mrf.mxu2 }
 0x17a   :  { %3342 = vmatpush.bf16.msrb.mxu0 %v4709_v27  ;;  %v4852_v27 = vld [vmem:[#allocation5 + $0xaa0] sm:$0xf]  ;;  %v3002_v30 = vadd.f32 %v5712_v5, %v2988_v8  ;;  %v4661_v43 = vor.u32 %v5331_v21, %v4660_v14  ;;  %v4840_v5 = vld [vmem:[#allocation5 + $0xa88] sm:$0xf] }
 0x17b   :  { %3356 = vmatpush.bf16.msrb.mxu1 %v4805_v28  ;;  %v3057_v28 = vpop.f32.mrf.mxu3  ;;  %v4853_v44 = vor.u32 %v5379_v39, %v4852_v27 }
 0x17c   :  { %3370 = vmatpush.bf16.msrb.mxu2 %v4901_v31  ;;  %v3069_v31 = vpop.f32.mrf.mxu0 }
 0x17d   :  { %3384 = vmatpush.bf16.msrb.mxu3 %v4997_v51  ;;  %v3042_v51 = vadd.f32 %v5725_v42, %v3028_v9 }
 0x17e   :  { %3343 = vmatpush.bf16.msrb.mxu0 %v4697_v13  ;;  %v5352_v13 = vld [vmem:[#allocation5 + $0x9d0] sm:$0xf0] }
 0x17f   :  { %3357 = vmatpush.bf16.msrb.mxu1 %v4793_v26  ;;  %v3016_v26 = vadd.f32 %v3015_v59, %v3002_v30  ;;  %v3056_v55 = vadd.f32 %v5728_v49, %v3042_v51  ;;  %v4745_v42 = vor.u32 %v5352_v13, %v4744_v37  ;;  %v592_v30 = vperm.slane %v5700_v19, 2 }
 0x180   :  { %3371 = vmatpush.bf16.msrb.mxu2 %v4889_v12  ;;  %v4936_v12 = vld [vmem:[#allocation5 + $0xb48] sm:$0xf] }
 0x181   :  { %3385 = vmatpush.bf16.msrb.mxu3 %v4985_v1  ;;  %v4841_v1 = vor.u32 %v5376_v54, %v4840_v5  ;;  %v4937_v4 = vor.u32 %v5400_v58, %v4936_v12  ;;  %v3030_v10 = vadd.f32 %v5731_v18, %v3016_v26  ;;  %v3070_v17 = vadd.f32 %v3069_v31, %v3056_v55 }
 0x182   :  { %3344 = vmatpush.bf16.msrb.mxu0 %v4685_v3  ;;  %v3085_v3 = vpop.f32.mrf.mxu1 }
 0x183   :  { %3358 = vmatpush.bf16.msrb.mxu1 %v4781_v60  ;;  %v3111_v56 = vpop.f32.mrf.mxu3  ;;  %v3044_v50 = vadd.f32 %v3043_v0, %v3030_v10  ;;  %v3084_v7 = vadd.f32 %v3083_v25, %v3070_v17 }
 0x184   :  { %3372 = vmatpush.bf16.msrb.mxu2 %v4877_v62  ;;  %v3071_v59 = vpop.f32.mrf.mxu0  ;;  %v3099_v62 = vpop.f32.mrf.mxu2 }
 0x185   :  { %3386 = vmatpush.bf16.msrb.mxu3 %v4973_v52  ;;  %v3058_v49 = vadd.f32 %v3057_v28, %v3044_v50  ;;  %v3098_v60 = vadd.f32 %v3097_v20, %v3084_v7 }
 0x186   :  { %3345 = vmatpush.bf16.msrb.mxu0 %v4673_v48 }
 0x187   :  { %3359 = vmatpush.bf16.msrb.mxu1 %v4769_v16  ;;  %v3072_v18 = vadd.f32 %v3071_v59, %v3058_v49  ;;  %v3112_v61 = vadd.f32 %v3111_v56, %v3098_v60 }
 0x188   :  { %3373 = vmatpush.bf16.msrb.mxu2 %v4865_v45 }
 0x189   :  { %3387 = vmatpush.bf16.msrb.mxu3 %v4961_v57  ;;  %v3086_v6 = vadd.f32 %v3085_v3, %v3072_v18 }
 0x18a   :  { %3346 = vmatpush.bf16.msrb.mxu0 %v4661_v43 }
 0x18b   :  { %3360 = vmatpush.bf16.msrb.mxu1 %v4757_v35  ;;  %v3113_v22 = vpop.f32.mrf.mxu3  ;;  %v3100_v33 = vadd.f32 %v3099_v62, %v3086_v6 }
 0x18c   :  { %3374 = vmatpush.bf16.msrb.mxu2 %v4853_v44 }
 0x18d   :  { %3388 = vmatpush.bf16.msrb.mxu3 %v4949_v47 }
 0x18e   :  { %3347 = vmatpush.bf16.msrb.mxu0 %v4649_v53  ;;  %v3125_v2 = vpop.f32.mrf.mxu0 }
 0x18f   :  { %3361 = vmatpush.bf16.msrb.mxu1 %v4745_v42  ;;  %v3139_v52 = vpop.f32.mrf.mxu1  ;;  %v3126_v63 = vadd.f32 %v3125_v2, %v3112_v61 }
 0x190   :  { %3375 = vmatpush.bf16.msrb.mxu2 %v4841_v1 }
 0x191   :  { %3389 = vmatpush.bf16.msrb.mxu3 %v4937_v4  ;;  %3348 = vmatmul.bf16.vlgmr.msrb.gmra.mxu0 %v5610_v32  ;;  %v3140_v8 = vadd.f32 %v3139_v52, %v3126_v63  ;;  %v3114_v32 = vadd.f32 %v3113_v22, %v3100_v33 }
 0x192   :  { %3362 = vmatmul.bf16.vlgmr.msrb.gmra.mxu1 %v5614_v41 }
 0x193   :  { %3376 = vmatmul.bf16.vlgmr.msrb.gmra.mxu2 %v5612_v38 }
 0x194   :  { %3390 = vmatmul.bf16.vlgmr.msrb.gmra.mxu3 %v5616_v46 }
 0x196   :  { %v3153_v11 = vpop.f32.mrf.mxu2  ;;  %v3127_v41 = vpop.f32.mrf.mxu0 }
 0x197   :  { %v3154_v15 = vadd.f32 %v3153_v11, %v3140_v8  ;;  %v3167_v48 = vpop.f32.mrf.mxu3  ;;  %v3128_v38 = vadd.f32 %v3127_v41, %v3114_v32  ;;  %v3141_v16 = vpop.f32.mrf.mxu1 }
 0x199   :  { %v3168_v9 = vadd.f32 %v3167_v48, %v3154_v15  ;;  %v3142_v46 = vadd.f32 %v3141_v16, %v3128_v38 }
 0x19b   :  { %3397 = vst [vmem:[#allocation8 + $0x8] sm:$0xff] %v3168_v9 }
 0x19e   :  { %v3155_v45 = vpop.f32.mrf.mxu2 }
 0x19f   :  { %v3156_v14 = vadd.f32 %v3155_v45, %v3142_v46  ;;  %v3169_v21 = vpop.f32.mrf.mxu3 }
 0x1a1   :  { %v3170_v23 = vadd.f32 %v3169_v21, %v3156_v14 }
 0x1a3   :  { %3400 = vst [vmem:[#allocation8 + $0x20] sm:$0xff] %v3170_v23 }
 0x1ae   :  { %v3181_v0 = vpop.f32.mrf.mxu0 }
 0x1af   :  { %v3195_v57 = vpop.f32.mrf.mxu1  ;;  %v3182_v31 = vadd.f32 %v3181_v0, %v592_v30 }
 0x1b1   :  { %v3196_v25 = vadd.f32 %v3195_v57, %v3182_v31 }
 0x1b6   :  { %v3209_v24 = vpop.f32.mrf.mxu2  ;;  %v3183_v39 = vpop.f32.mrf.mxu0 }
 0x1b7   :  { %v3223_v27 = vpop.f32.mrf.mxu3  ;;  %v3197_v28 = vpop.f32.mrf.mxu1  ;;  %v3210_v35 = vadd.f32 %v3209_v24, %v3196_v25  ;;  %v3184_v44 = vadd.f32 %v3183_v39, %v592_v30 }
 0x1b9   :  { %v3224_v40 = vadd.f32 %v3223_v27, %v3210_v35  ;;  %v3198_v47 = vadd.f32 %v3197_v28, %v3184_v44 }
 0x1be   :  { %v3211_v29 = vpop.f32.mrf.mxu2 }
 0x1bf   :  { %v3225_v34 = vpop.f32.mrf.mxu3  ;;  %v3212_v26 = vadd.f32 %v3211_v29, %v3198_v47 }
 0x1c1   :  { %v3226_v19 = vadd.f32 %v3225_v34, %v3212_v26 }
 0x1ce   :  { %v3237_v43 = vpop.f32.mrf.mxu0 }
 0x1cf   :  { %v3251_v51 = vpop.f32.mrf.mxu1  ;;  %v3238_v5 = vadd.f32 %v3237_v43, %v3224_v40 }
 0x1d1   :  { %v3252_v12 = vadd.f32 %v3251_v51, %v3238_v5 }
 0x1d6   :  { %v3265_v36 = vpop.f32.mrf.mxu2  ;;  %v3239_v13 = vpop.f32.mrf.mxu0 }
 0x1d7   :  { %v3279_v37 = vpop.f32.mrf.mxu3  ;;  %v3253_v54 = vpop.f32.mrf.mxu1  ;;  %v3266_v42 = vadd.f32 %v3265_v36, %v3252_v12  ;;  %v3240_v20 = vadd.f32 %v3239_v13, %v3226_v19 }
 0x1d9   :  { %v3280_v4 = vadd.f32 %v3279_v37, %v3266_v42  ;;  %v3254_v17 = vadd.f32 %v3253_v54, %v3240_v20 }
 0x1de   :  { %v3267_v58 = vpop.f32.mrf.mxu2 }
 0x1df   :  { %v3281_v53 = vpop.f32.mrf.mxu3  ;;  %v3268_v59 = vadd.f32 %v3267_v58, %v3254_v17 }
 0x1e1   :  { %v3282_v60 = vadd.f32 %v3281_v53, %v3268_v59 }
 0x1ee   :  { %v3293_v55 = vpop.f32.mrf.mxu0 }
 0x1ef   :  { %v3307_v1 = vpop.f32.mrf.mxu1  ;;  %v3294_v56 = vadd.f32 %v3293_v55, %v3280_v4 }
 0x1f1   :  { %v3308_v7 = vadd.f32 %v3307_v1, %v3294_v56 }
 0x1f6   :  { %v3321_v10 = vpop.f32.mrf.mxu2  ;;  %v3295_v3 = vpop.f32.mrf.mxu0 }
 0x1f7   :  { %v3335_v50 = vpop.f32.mrf.mxu3  ;;  %v3309_v49 = vpop.f32.mrf.mxu1  ;;  %v3322_v18 = vadd.f32 %v3321_v10, %v3308_v7  ;;  %v3296_v62 = vadd.f32 %v3295_v3, %v3282_v60 }
 0x1f9   :  { %v3336_v22 = vadd.f32 %v3335_v50, %v3322_v18  ;;  %v3310_v6 = vadd.f32 %v3309_v49, %v3296_v62 }
 0x1fe   :  { %v3323_v61 = vpop.f32.mrf.mxu2 }
 0x1ff   :  { %v3337_v2 = vpop.f32.mrf.mxu3  ;;  %v3324_v8 = vadd.f32 %v3323_v61, %v3310_v6 }
 0x201   :  { %v3338_v15 = vadd.f32 %v3337_v2, %v3324_v8 }
 0x20e   :  { %v3349_v52 = vpop.f32.mrf.mxu0 }
 0x20f   :  { %v3350_v63 = vadd.f32 %v3349_v52, %v3336_v22  ;;  %v3363_v33 = vpop.f32.mrf.mxu1 }
 0x211   :  { %v3364_v11 = vadd.f32 %v3363_v33, %v3350_v63 }
 0x216   :  { %v3377_v32 = vpop.f32.mrf.mxu2  ;;  %v3351_v38 = vpop.f32.mrf.mxu0 }
 0x217   :  { %v3378_v41 = vadd.f32 %v3377_v32, %v3364_v11  ;;  %v3391_v48 = vpop.f32.mrf.mxu3  ;;  %v3352_v16 = vadd.f32 %v3351_v38, %v3338_v15  ;;  %v3365_v46 = vpop.f32.mrf.mxu1 }
 0x219   :  { %v3392_v9 = vadd.f32 %v3391_v48, %v3378_v41  ;;  %v3366_v45 = vadd.f32 %v3365_v46, %v3352_v16 }
 0x21b   :  { %3398 = vst [vmem:[#allocation8 + $0x10] sm:$0xff] %v3392_v9 }
 0x21e   :  { %v3379_v14 = vpop.f32.mrf.mxu2 }
 0x21f   :  { %v3380_v21 = vadd.f32 %v3379_v14, %v3366_v45  ;;  %v3393_v23 = vpop.f32.mrf.mxu3 }
 0x221   :  { %v3394_v0 = vadd.f32 %v3393_v23, %v3380_v21 }
 0x223   :  { %3401 = vst [vmem:[#allocation8 + $0x28] sm:$0xff] %v3394_v0 }
 0x224   :  { %3414 = dma.vmem_to_hbm [thread:$0]  %s3407_s2, 768, %s3409_s5, [#allocation4], %s5543_s6, %s5543_s6, %s5544_s7  }
 0x225   :  { %5533 = dma.done.wait [#allocation4], 768  }
 0x226   :  { %5534 = vsyncadd [#allocation4], 4294966528 }
 0x227   :  { %3419 = vsyncpa [#allocation3], 1 }
 0x228   :  { %3420 = vsyncpa [#allocation6], 1 }
 0x229   :  { %3421 = vsyncpa [#allocation4], 1 }

</bundles_post_ra>
